<compile_context>
chip_gen: v6e
topology: v6e:2x2x1
jax: 0.10.0
libtpu: 0.0.40
codegen_flags: <defaults>
</compile_context>

<pallas_src>
import functools

import jax
import jax.numpy as jnp
from jax.experimental import pallas as pl
from jax.experimental.pallas import tpu as pltpu


def _vmem_limit_bytes(arrays, extra_bytes=0):
    total = extra_bytes + sum(int(a.size) * a.dtype.itemsize for a in arrays)
    # headroom for double-buffered DMA copies + slack; clamp to v7x-safe 64 MiB.
    return int(min(max(2 * total + (1 << 20), 4 << 20), 64 << 20))


# -----------------------------------------------------------------------------
# Fused bidirectional LSTM layer kernel.
#
# Inputs (all VMEM-resident, no grid):
#   x_refs[i]  : (L*Bp, Din_i)  time-major flattened input feature parts
#   wih_refs[i]: (Din_i, 8H)    input->gates weights, [fwd 4H | bwd 4H]
#   whh_f      : (H, 4H)        hidden->gates (forward)
#   whh_b      : (H, 4H)        hidden->gates (backward)
#   b          : (1, 8H)        b_ih + b_hh for both directions
# Outputs:
#   out_f, out_b : (L, Bp, H)   per-timestep hidden states per direction
# Scratch:
#   xpf, xpb   : (L*Bp, 4H)     precomputed input projections per direction
# -----------------------------------------------------------------------------
def _bilstm_kernel(*args, n_x):
    x_refs = args[:n_x]
    wih_refs = args[n_x:2 * n_x]
    whh_f_ref, whh_b_ref, b_ref = args[2 * n_x:2 * n_x + 3]
    out_f_ref, out_b_ref = args[2 * n_x + 3:2 * n_x + 5]
    xpf_scr, xpb_scr = args[2 * n_x + 5:2 * n_x + 7]

    L, Bp, H = out_f_ref.shape

    # --- Hoisted input projection: one wide MXU pass for both directions,
    #     bias folded in once (not re-added every timestep). ---
    xp = jnp.dot(x_refs[0][...], wih_refs[0][...],
                 preferred_element_type=jnp.float32)
    for i in range(1, n_x):
        xp = xp + jnp.dot(x_refs[i][...], wih_refs[i][...],
                          preferred_element_type=jnp.float32)
    xp = xp + b_ref[...]
    xpf_scr[...] = xp[:, :4 * H]
    xpb_scr[...] = xp[:, 4 * H:]

    # NOTE: gate slices sit at lane offsets k*H; with H=32 this costs some XLU
    # lane work per step. A gate-on-sublane weight layout would remove it.
    def cell(gates, c):
        i = jax.nn.sigmoid(gates[:, 0 * H:1 * H])
        f = jax.nn.sigmoid(gates[:, 1 * H:2 * H])
        g = jnp.tanh(gates[:, 2 * H:3 * H])
        o = jax.nn.sigmoid(gates[:, 3 * H:4 * H])
        c_new = f * c + i * g
        return o * jnp.tanh(c_new), c_new

    def step(t, carry):
        hf, cf, hb, cb = carry
        tb = L - 1 - t
        rf = pl.multiple_of(t * Bp, Bp)
        rb = pl.multiple_of(tb * Bp, Bp)
        # Only the recurrent matmuls remain inside the serial loop; the two
        # directions are independent and overlap on the MXU.
        gf = xpf_scr[pl.ds(rf, Bp), :] + jnp.dot(
            hf, whh_f_ref[...], preferred_element_type=jnp.float32)
        gb = xpb_scr[pl.ds(rb, Bp), :] + jnp.dot(
            hb, whh_b_ref[...], preferred_element_type=jnp.float32)
        hf, cf = cell(gf, cf)
        hb, cb = cell(gb, cb)
        out_f_ref[t] = hf
        out_b_ref[tb] = hb
        return hf, cf, hb, cb

    z = jnp.zeros((Bp, H), jnp.float32)
    unroll = True if L <= 16 else 4
    jax.lax.fori_loop(0, L, step, (z, z, z, z), unroll=unroll)


def _bilstm_layer(x_parts, wih_parts, whh_f, whh_b, b, *, L, Bp, H):
    n_x = len(x_parts)
    N = L * Bp
    kernel = functools.partial(_bilstm_kernel, n_x=n_x)
    extra = 4 * (2 * N * 4 * H + 2 * N * H)   # scratch + outputs (f32 bytes)
    vmem = _vmem_limit_bytes(list(x_parts) + list(wih_parts) + [whh_f, whh_b, b],
                             extra_bytes=extra)
    out_f, out_b = pl.pallas_call(
        kernel,
        out_shape=(jax.ShapeDtypeStruct((L, Bp, H), jnp.float32),
                   jax.ShapeDtypeStruct((L, Bp, H), jnp.float32)),
        in_specs=[pl.BlockSpec(memory_space=pltpu.MemorySpace.VMEM)] * (2 * n_x + 3),
        out_specs=(pl.BlockSpec(memory_space=pltpu.MemorySpace.VMEM),
                   pl.BlockSpec(memory_space=pltpu.MemorySpace.VMEM)),
        scratch_shapes=[
            pltpu.VMEM((N, 4 * H), jnp.float32),   # fwd input projection
            pltpu.VMEM((N, 4 * H), jnp.float32),   # bwd input projection
        ],
        compiler_params=pltpu.CompilerParams(vmem_limit_bytes=vmem),
    )(*x_parts, *wih_parts, whh_f, whh_b, b)
    # Flattened time-major views for the next consumer (free XLA reshape).
    return out_f.reshape(N, H), out_b.reshape(N, H)


# -----------------------------------------------------------------------------
# MLP head: Linear -> LeakyReLU x3, then sigmoid, fused and row-tiled.
# Consumes the last biLSTM layer's fwd/bwd halves directly (W1 split) so the
# (B*L, 2H) concatenation is never materialized.
# -----------------------------------------------------------------------------
def _mlp_kernel(hf_ref, hb_ref, w1f_ref, w1b_ref, b1_ref, w2_ref, b2_ref,
                w3_ref, b3_ref, out_ref):
    def leaky(v):
        return jnp.where(v >= 0, v, 0.01 * v)   # nn.LeakyReLU default slope

    h = leaky(jnp.dot(hf_ref[...], w1f_ref[...], preferred_element_type=jnp.float32)
              + jnp.dot(hb_ref[...], w1b_ref[...], preferred_element_type=jnp.float32)
              + b1_ref[...])
    h = leaky(jnp.dot(h, w2_ref[...], preferred_element_type=jnp.float32) + b2_ref[...])
    h = leaky(jnp.dot(h, w3_ref[...], preferred_element_type=jnp.float32) + b3_ref[...])
    out_ref[...] = jax.nn.sigmoid(h)


def _mlp_head(hf, hb, w1, b1, w2, b2, w3, b3, *, row_tile=512):
    N, H = hf.shape
    w1f, w1b = w1[:H], w1[H:]
    if N <= row_tile:
        TM, Np = N, N
    else:
        TM = row_tile
        Np = ((N + TM - 1) // TM) * TM
    if Np != N:
        pad = ((0, Np - N), (0, 0))
        hf = jnp.pad(hf, pad)
        hb = jnp.pad(hb, pad)

    full = lambda i: (0, 0)
    row = lambda i: (i, 0)
    out = pl.pallas_call(
        _mlp_kernel,
        out_shape=jax.ShapeDtypeStruct((Np, 1), jnp.float32),
        grid=(Np // TM,),
        in_specs=[
            pl.BlockSpec((TM, H), row),
            pl.BlockSpec((TM, H), row),
            pl.BlockSpec(w1f.shape, full),
            pl.BlockSpec(w1b.shape, full),
            pl.BlockSpec(b1.shape, full),
            pl.BlockSpec(w2.shape, full),
            pl.BlockSpec(b2.shape, full),
            pl.BlockSpec(w3.shape, full),
            pl.BlockSpec(b3.shape, full),
        ],
        out_specs=pl.BlockSpec((TM, 1), row),
        compiler_params=pltpu.CompilerParams(
            dimension_semantics=("parallel",),
            vmem_limit_bytes=_vmem_limit_bytes([hf, hb, w1, b1, w2, b2, w3, b3]),
        ),
    )(hf, hb, w1f, w1b, b1, w2, b2, w3, b3)
    return out[:N]


# -----------------------------------------------------------------------------
# Full forward pass.
# -----------------------------------------------------------------------------
def lstm_extractor_forward(x, params):
    """x: (B, L, D) float32 (batch_first) -> (B, L) float32 in [0, 1]."""
    B, L, D = x.shape
    H = params["lstm"][0]["whh_f"].shape[0]
    Bp = max(8, ((B + 7) // 8) * 8)                 # pad batch to sublane multiple

    x_p = jnp.pad(x, ((0, Bp - B), (0, 0), (0, 0)))            # (Bp, L, D)
    seq = jnp.transpose(x_p, (1, 0, 2)).reshape(L * Bp, D)     # time-major, flat

    parts = (seq,)
    for layer in params["lstm"]:
        wih = layer["wih"]
        wih_parts = (wih,) if len(parts) == 1 else (wih[:H], wih[H:])
        parts = _bilstm_layer(parts, wih_parts, layer["whh_f"], layer["whh_b"],
                              layer["b"], L=L, Bp=Bp, H=H)

    out = _mlp_head(parts[0], parts[1],
                    *params["nn1"], *params["nn2"], *params["nn3"])   # (L*Bp, 1)
    # rows are time-major (t, b): map back to (B, L), dropping batch padding.
    return out.reshape(L, Bp)[:, :B].T


# -----------------------------------------------------------------------------
# Deterministic parameter initialization (PyTorch-like uniform(-1/sqrt(fan), .))
# -----------------------------------------------------------------------------
def init_params(key, input_size, hidden_size, num_layers=3):
    H = hidden_size
    bound = 1.0 / (H ** 0.5)

    def u(k, shape, bnd):
        return jax.random.uniform(k, shape, jnp.float32, -bnd, bnd)

    layers = []
    for li in range(num_layers):
        din = input_size if li == 0 else 2 * H
        key, *ks = jax.random.split(key, 9)
        wih_f = u(ks[0], (din, 4 * H), bound)
        whh_f = u(ks[1], (H, 4 * H), bound)
        bih_f = u(ks[2], (4 * H,), bound)
        bhh_f = u(ks[3], (4 * H,), bound)
        wih_b = u(ks[4], (din, 4 * H), bound)
        whh_b = u(ks[5], (H, 4 * H), bound)
        bih_b = u(ks[6], (4 * H,), bound)
        bhh_b = u(ks[7], (4 * H,), bound)
        layers.append(dict(
            wih=jnp.concatenate([wih_f, wih_b], axis=1),                  # (din, 8H)
            whh_f=whh_f, whh_b=whh_b,
            b=jnp.concatenate([bih_f + bhh_f, bih_b + bhh_b])[None, :],   # (1, 8H)
        ))

    def lin(k, fan_in, fan_out):
        bnd = 1.0 / (fan_in ** 0.5)
        k1, k2 = jax.random.split(k)
        return u(k1, (fan_in, fan_out), bnd), u(k2, (1, fan_out), bnd)

    key, k1, k2, k3 = jax.random.split(key, 4)
    return {"lstm": layers,
            "nn1": lin(k1, 2 * H, H),
            "nn2": lin(k2, H, H // 2),
            "nn3": lin(k3, H // 2, 1)}


# -----------------------------------------------------------------------------
# Pure-JAX reference (correctness check only)
# -----------------------------------------------------------------------------
def _ref_lstm_dir(seq, wih, whh, b, reverse):
    L, B, _ = seq.shape
    H = whh.shape[0]
    xs = seq[::-1] if reverse else seq

    def step(carry, x_t):
        h, c = carry
        g = x_t @ wih + h @ whh + b
        i = jax.nn.sigmoid(g[:, :H])
        f = jax.nn.sigmoid(g[:, H:2 * H])
        gg = jnp.tanh(g[:, 2 * H:3 * H])
        o = jax.nn.sigmoid(g[:, 3 * H:])
        c = f * c + i * gg
        h = o * jnp.tanh(c)
        return (h, c), h

    init = (jnp.zeros((B, H), jnp.float32), jnp.zeros((B, H), jnp.float32))
    _, hs = jax.lax.scan(step, init, xs)
    return hs[::-1] if reverse else hs


def reference_forward(x, params):
    B, L, _ = x.shape
    H = params["lstm"][0]["whh_f"].shape[0]
    seq = jnp.transpose(x, (1, 0, 2))
    for layer in params["lstm"]:
        wih, b = layer["wih"], layer["b"]
        fwd = _ref_lstm_dir(seq, wih[:, :4 * H], layer["whh_f"], b[:, :4 * H], False)
        bwd = _ref_lstm_dir(seq, wih[:, 4 * H:], layer["whh_b"], b[:, 4 * H:], True)
        seq = jnp.concatenate([fwd, bwd], axis=-1)
    feats = jnp.transpose(seq, (1, 0, 2)).reshape(B * L, -1)

    def leaky(v):
        return jnp.where(v >= 0, v, 0.01 * v)

    w1, b1 = params["nn1"]
    w2, b2 = params["nn2"]
    w3, b3 = params["nn3"]
    h = leaky(feats @ w1 + b1)
    h = leaky(h @ w2 + b2)
    h = leaky(h @ w3 + b3)
    return jax.nn.sigmoid(h.reshape(B, L))


if __name__ == "__main__":
    B, L, D, H = 2, 8, 16, 32
    key = jax.random.PRNGKey(0)
    k_param, k_x = jax.random.split(key)
    params = init_params(k_param, input_size=D, hidden_size=H)
    x = jax.random.normal(k_x, (B, L, D), dtype=jnp.float32)

    out = jax.block_until_ready(lstm_extractor_forward(x, params))
    ref = reference_forward(x, params)

    assert out.shape == (B, L)
    max_err = float(jnp.max(jnp.abs(out - ref)))
    assert jnp.allclose(out, ref, atol=1e-3, rtol=1e-3), f"mismatch: {max_err}"

    print("KERNEL_OK")
</pallas_src>

<mosaic_0001>
module attributes {stable_mosaic.version = 11 : i64} {
  func.func @_bilstm_kernel(%arg0: memref<64x16xf32, #tpu.memory_space<vmem>>, %arg1: memref<16x256xf32, #tpu.memory_space<vmem>>, %arg2: memref<32x128xf32, #tpu.memory_space<vmem>>, %arg3: memref<32x128xf32, #tpu.memory_space<vmem>>, %arg4: memref<1x256xf32, #tpu.memory_space<vmem>>, %arg5: memref<8x8x32xf32, #tpu.memory_space<vmem>>, %arg6: memref<8x8x32xf32, #tpu.memory_space<vmem>>, %arg7: memref<64x128xf32, #tpu.memory_space<vmem>>, %arg8: memref<64x128xf32, #tpu.memory_space<vmem>>) attributes {dimension_semantics = [], scalar_prefetch = 0 : i64, scratch_operands = 2 : i64, tpu.core_type = #tpu.core_type<tc>} {
    %c0 = arith.constant 0 : index
    %c0_0 = arith.constant 0 : index
    %0 = vector.load %arg0[%c0, %c0_0] : memref<64x16xf32, #tpu.memory_space<vmem>>, vector<64x16xf32>
    %c0_1 = arith.constant 0 : index
    %c0_2 = arith.constant 0 : index
    %1 = vector.load %arg1[%c0_1, %c0_2] : memref<16x256xf32, #tpu.memory_space<vmem>>, vector<16x256xf32>
    %cst = arith.constant dense<0.000000e+00> : vector<64x256xf32>
    %2 = tpu.matmul %0, %1, %cst {dimension_numbers = #tpu.dot_dimension_numbers<[1], [0], [0], [1], [0, 0, 1, 1], [], []>} : vector<64x16xf32>, vector<16x256xf32>, vector<64x256xf32> -> vector<64x256xf32>
    %c0_3 = arith.constant 0 : index
    %c0_4 = arith.constant 0 : index
    %3 = vector.load %arg4[%c0_3, %c0_4] : memref<1x256xf32, #tpu.memory_space<vmem>>, vector<1x256xf32>
    %4 = vector.broadcast %3 : vector<1x256xf32> to vector<64x256xf32>
    %5 = arith.addf %2, %4 : vector<64x256xf32>
    %6 = vector.extract_strided_slice %5 {offsets = [0, 0], sizes = [64, 128], strides = [1, 1]} : vector<64x256xf32> to vector<64x128xf32>
    %c0_5 = arith.constant 0 : index
    %c0_6 = arith.constant 0 : index
    %7 = vector.load %arg7[%c0_5, %c0_6] : memref<64x128xf32, #tpu.memory_space<vmem>>, vector<64x128xf32>
    tpu.vector_store %arg7[%c0_5, %c0_6], %6 {strides = array<i32>} : memref<64x128xf32, #tpu.memory_space<vmem>>, vector<64x128xf32>,
    %8 = vector.extract_strided_slice %5 {offsets = [0, 128], sizes = [64, 128], strides = [1, 1]} : vector<64x256xf32> to vector<64x128xf32>
    %c0_7 = arith.constant 0 : index
    %c0_8 = arith.constant 0 : index
    %9 = vector.load %arg8[%c0_7, %c0_8] : memref<64x128xf32, #tpu.memory_space<vmem>>, vector<64x128xf32>
    tpu.vector_store %arg8[%c0_7, %c0_8], %8 {strides = array<i32>} : memref<64x128xf32, #tpu.memory_space<vmem>>, vector<64x128xf32>,
    %cst_9 = arith.constant 0.000000e+00 : f32
    %10 = vector.broadcast %cst_9 : f32 to vector<8x32xf32>
    %c0_i32 = arith.constant 0 : i32
    %c7_i32 = arith.constant 7 : i32
    %11 = arith.subi %c7_i32, %c0_i32 : i32
    %c8_i32 = arith.constant 8 : i32
    %12 = arith.muli %c0_i32, %c8_i32 : i32
    %13 = tpu.assume_multiple %12, 8 : i32
    %c8_i32_10 = arith.constant 8 : i32
    %14 = arith.muli %11, %c8_i32_10 : i32
    %15 = tpu.assume_multiple %14, 8 : i32
    %16 = arith.index_cast %13 : i32 to index
    %c0_11 = arith.constant 0 : index
    %17 = vector.load %arg7[%16, %c0_11] : memref<64x128xf32, #tpu.memory_space<vmem>>, vector<8x128xf32>
    %c0_12 = arith.constant 0 : index
    %c0_13 = arith.constant 0 : index
    %18 = vector.load %arg2[%c0_12, %c0_13] : memref<32x128xf32, #tpu.memory_space<vmem>>, vector<32x128xf32>
    %cst_14 = arith.constant dense<0.000000e+00> : vector<8x128xf32>
    %19 = tpu.matmul %10, %18, %cst_14 {dimension_numbers = #tpu.dot_dimension_numbers<[1], [0], [0], [1], [0, 0, 1, 1], [], []>} : vector<8x32xf32>, vector<32x128xf32>, vector<8x128xf32> -> vector<8x128xf32>
    %20 = arith.addf %17, %19 : vector<8x128xf32>
    %21 = arith.index_cast %15 : i32 to index
    %c0_15 = arith.constant 0 : index
    %22 = vector.load %arg8[%21, %c0_15] : memref<64x128xf32, #tpu.memory_space<vmem>>, vector<8x128xf32>
    %c0_16 = arith.constant 0 : index
    %c0_17 = arith.constant 0 : index
    %23 = vector.load %arg3[%c0_16, %c0_17] : memref<32x128xf32, #tpu.memory_space<vmem>>, vector<32x128xf32>
    %cst_18 = arith.constant dense<0.000000e+00> : vector<8x128xf32>
    %24 = tpu.matmul %10, %23, %cst_18 {dimension_numbers = #tpu.dot_dimension_numbers<[1], [0], [0], [1], [0, 0, 1, 1], [], []>} : vector<8x32xf32>, vector<32x128xf32>, vector<8x128xf32> -> vector<8x128xf32>
    %25 = arith.addf %22, %24 : vector<8x128xf32>
    %26 = vector.extract_strided_slice %20 {offsets = [0, 0], sizes = [8, 32], strides = [1, 1]} : vector<8x128xf32> to vector<8x32xf32>
    %27 = arith.negf %26 : vector<8x32xf32>
    %28 = math.exp %27 : vector<8x32xf32>
    %cst_19 = arith.constant 1.000000e+00 : f32
    %29 = vector.broadcast %cst_19 : f32 to vector<8x32xf32>
    %30 = arith.addf %29, %28 : vector<8x32xf32>
    %31 = arith.divf %29, %30 : vector<8x32xf32>
    %32 = vector.extract_strided_slice %20 {offsets = [0, 32], sizes = [8, 32], strides = [1, 1]} : vector<8x128xf32> to vector<8x32xf32>
    %33 = arith.negf %32 : vector<8x32xf32>
    %34 = math.exp %33 : vector<8x32xf32>
    %cst_20 = arith.constant 1.000000e+00 : f32
    %35 = vector.broadcast %cst_20 : f32 to vector<8x32xf32>
    %36 = arith.addf %35, %34 : vector<8x32xf32>
    %37 = arith.divf %35, %36 : vector<8x32xf32>
    %38 = vector.extract_strided_slice %20 {offsets = [0, 64], sizes = [8, 32], strides = [1, 1]} : vector<8x128xf32> to vector<8x32xf32>
    %39 = math.tanh %38 : vector<8x32xf32>
    %40 = vector.extract_strided_slice %20 {offsets = [0, 96], sizes = [8, 32], strides = [1, 1]} : vector<8x128xf32> to vector<8x32xf32>
    %41 = arith.negf %40 : vector<8x32xf32>
    %42 = math.exp %41 : vector<8x32xf32>
    %cst_21 = arith.constant 1.000000e+00 : f32
    %43 = vector.broadcast %cst_21 : f32 to vector<8x32xf32>
    %44 = arith.addf %43, %42 : vector<8x32xf32>
    %45 = arith.divf %43, %44 : vector<8x32xf32>
    %46 = arith.mulf %37, %10 : vector<8x32xf32>
    %47 = arith.mulf %31, %39 : vector<8x32xf32>
    %48 = arith.addf %46, %47 : vector<8x32xf32>
    %49 = math.tanh %48 : vector<8x32xf32>
    %50 = arith.mulf %45, %49 : vector<8x32xf32>
    %51 = vector.extract_strided_slice %25 {offsets = [0, 0], sizes = [8, 32], strides = [1, 1]} : vector<8x128xf32> to vector<8x32xf32>
    %52 = arith.negf %51 : vector<8x32xf32>
    %53 = math.exp %52 : vector<8x32xf32>
    %cst_22 = arith.constant 1.000000e+00 : f32
    %54 = vector.broadcast %cst_22 : f32 to vector<8x32xf32>
    %55 = arith.addf %54, %53 : vector<8x32xf32>
    %56 = arith.divf %54, %55 : vector<8x32xf32>
    %57 = vector.extract_strided_slice %25 {offsets = [0, 32], sizes = [8, 32], strides = [1, 1]} : vector<8x128xf32> to vector<8x32xf32>
    %58 = arith.negf %57 : vector<8x32xf32>
    %59 = math.exp %58 : vector<8x32xf32>
    %cst_23 = arith.constant 1.000000e+00 : f32
    %60 = vector.broadcast %cst_23 : f32 to vector<8x32xf32>
    %61 = arith.addf %60, %59 : vector<8x32xf32>
    %62 = arith.divf %60, %61 : vector<8x32xf32>
    %63 = vector.extract_strided_slice %25 {offsets = [0, 64], sizes = [8, 32], strides = [1, 1]} : vector<8x128xf32> to vector<8x32xf32>
    %64 = math.tanh %63 : vector<8x32xf32>
    %65 = vector.extract_strided_slice %25 {offsets = [0, 96], sizes = [8, 32], strides = [1, 1]} : vector<8x128xf32> to vector<8x32xf32>
    %66 = arith.negf %65 : vector<8x32xf32>
    %67 = math.exp %66 : vector<8x32xf32>
    %cst_24 = arith.constant 1.000000e+00 : f32
    %68 = vector.broadcast %cst_24 : f32 to vector<8x32xf32>
    %69 = arith.addf %68, %67 : vector<8x32xf32>
    %70 = arith.divf %68, %69 : vector<8x32xf32>
    %71 = arith.mulf %62, %10 : vector<8x32xf32>
    %72 = arith.mulf %56, %64 : vector<8x32xf32>
    %73 = arith.addf %71, %72 : vector<8x32xf32>
    %74 = math.tanh %73 : vector<8x32xf32>
    %75 = arith.mulf %70, %74 : vector<8x32xf32>
    %76 = arith.index_cast %c0_i32 : i32 to index
    %c0_25 = arith.constant 0 : index
    %c0_26 = arith.constant 0 : index
    %77 = vector.load %arg5[%76, %c0_25, %c0_26] : memref<8x8x32xf32, #tpu.memory_space<vmem>>, vector<1x8x32xf32>
    %78 = vector.shape_cast %77 : vector<1x8x32xf32> to vector<8x32xf32>
    %79 = vector.shape_cast %50 : vector<8x32xf32> to vector<1x8x32xf32>
    tpu.vector_store %arg5[%76, %c0_25, %c0_26], %79 {strides = array<i32>} : memref<8x8x32xf32, #tpu.memory_space<vmem>>, vector<1x8x32xf32>,
    %80 = arith.index_cast %11 : i32 to index
    %c0_27 = arith.constant 0 : index
    %c0_28 = arith.constant 0 : index
    %81 = vector.load %arg6[%80, %c0_27, %c0_28] : memref<8x8x32xf32, #tpu.memory_space<vmem>>, vector<1x8x32xf32>
    %82 = vector.shape_cast %81 : vector<1x8x32xf32> to vector<8x32xf32>
    %83 = vector.shape_cast %75 : vector<8x32xf32> to vector<1x8x32xf32>
    tpu.vector_store %arg6[%80, %c0_27, %c0_28], %83 {strides = array<i32>} : memref<8x8x32xf32, #tpu.memory_space<vmem>>, vector<1x8x32xf32>,
    %c1_i32 = arith.constant 1 : i32
    %c7_i32_29 = arith.constant 7 : i32
    %84 = arith.subi %c7_i32_29, %c1_i32 : i32
    %c8_i32_30 = arith.constant 8 : i32
    %85 = arith.muli %c1_i32, %c8_i32_30 : i32
    %86 = tpu.assume_multiple %85, 8 : i32
    %c8_i32_31 = arith.constant 8 : i32
    %87 = arith.muli %84, %c8_i32_31 : i32
    %88 = tpu.assume_multiple %87, 8 : i32
    %89 = arith.index_cast %86 : i32 to index
    %c0_32 = arith.constant 0 : index
    %90 = vector.load %arg7[%89, %c0_32] : memref<64x128xf32, #tpu.memory_space<vmem>>, vector<8x128xf32>
    %c0_33 = arith.constant 0 : index
    %c0_34 = arith.constant 0 : index
    %91 = vector.load %arg2[%c0_33, %c0_34] : memref<32x128xf32, #tpu.memory_space<vmem>>, vector<32x128xf32>
    %cst_35 = arith.constant dense<0.000000e+00> : vector<8x128xf32>
    %92 = tpu.matmul %50, %91, %cst_35 {dimension_numbers = #tpu.dot_dimension_numbers<[1], [0], [0], [1], [0, 0, 1, 1], [], []>} : vector<8x32xf32>, vector<32x128xf32>, vector<8x128xf32> -> vector<8x128xf32>
    %93 = arith.addf %90, %92 : vector<8x128xf32>
    %94 = arith.index_cast %88 : i32 to index
    %c0_36 = arith.constant 0 : index
    %95 = vector.load %arg8[%94, %c0_36] : memref<64x128xf32, #tpu.memory_space<vmem>>, vector<8x128xf32>
    %c0_37 = arith.constant 0 : index
    %c0_38 = arith.constant 0 : index
    %96 = vector.load %arg3[%c0_37, %c0_38] : memref<32x128xf32, #tpu.memory_space<vmem>>, vector<32x128xf32>
    %cst_39 = arith.constant dense<0.000000e+00> : vector<8x128xf32>
    %97 = tpu.matmul %75, %96, %cst_39 {dimension_numbers = #tpu.dot_dimension_numbers<[1], [0], [0], [1], [0, 0, 1, 1], [], []>} : vector<8x32xf32>, vector<32x128xf32>, vector<8x128xf32> -> vector<8x128xf32>
    %98 = arith.addf %95, %97 : vector<8x128xf32>
    %99 = vector.extract_strided_slice %93 {offsets = [0, 0], sizes = [8, 32], strides = [1, 1]} : vector<8x128xf32> to vector<8x32xf32>
    %100 = arith.negf %99 : vector<8x32xf32>
    %101 = math.exp %100 : vector<8x32xf32>
    %cst_40 = arith.constant 1.000000e+00 : f32
    %102 = vector.broadcast %cst_40 : f32 to vector<8x32xf32>
    %103 = arith.addf %102, %101 : vector<8x32xf32>
    %104 = arith.divf %102, %103 : vector<8x32xf32>
    %105 = vector.extract_strided_slice %93 {offsets = [0, 32], sizes = [8, 32], strides = [1, 1]} : vector<8x128xf32> to vector<8x32xf32>
    %106 = arith.negf %105 : vector<8x32xf32>
    %107 = math.exp %106 : vector<8x32xf32>
    %cst_41 = arith.constant 1.000000e+00 : f32
    %108 = vector.broadcast %cst_41 : f32 to vector<8x32xf32>
    %109 = arith.addf %108, %107 : vector<8x32xf32>
    %110 = arith.divf %108, %109 : vector<8x32xf32>
    %111 = vector.extract_strided_slice %93 {offsets = [0, 64], sizes = [8, 32], strides = [1, 1]} : vector<8x128xf32> to vector<8x32xf32>
    %112 = math.tanh %111 : vector<8x32xf32>
    %113 = vector.extract_strided_slice %93 {offsets = [0, 96], sizes = [8, 32], strides = [1, 1]} : vector<8x128xf32> to vector<8x32xf32>
    %114 = arith.negf %113 : vector<8x32xf32>
    %115 = math.exp %114 : vector<8x32xf32>
    %cst_42 = arith.constant 1.000000e+00 : f32
    %116 = vector.broadcast %cst_42 : f32 to vector<8x32xf32>
    %117 = arith.addf %116, %115 : vector<8x32xf32>
    %118 = arith.divf %116, %117 : vector<8x32xf32>
    %119 = arith.mulf %110, %48 : vector<8x32xf32>
    %120 = arith.mulf %104, %112 : vector<8x32xf32>
    %121 = arith.addf %119, %120 : vector<8x32xf32>
    %122 = math.tanh %121 : vector<8x32xf32>
    %123 = arith.mulf %118, %122 : vector<8x32xf32>
    %124 = vector.extract_strided_slice %98 {offsets = [0, 0], sizes = [8, 32], strides = [1, 1]} : vector<8x128xf32> to vector<8x32xf32>
    %125 = arith.negf %124 : vector<8x32xf32>
    %126 = math.exp %125 : vector<8x32xf32>
    %cst_43 = arith.constant 1.000000e+00 : f32
    %127 = vector.broadcast %cst_43 : f32 to vector<8x32xf32>
    %128 = arith.addf %127, %126 : vector<8x32xf32>
    %129 = arith.divf %127, %128 : vector<8x32xf32>
    %130 = vector.extract_strided_slice %98 {offsets = [0, 32], sizes = [8, 32], strides = [1, 1]} : vector<8x128xf32> to vector<8x32xf32>
    %131 = arith.negf %130 : vector<8x32xf32>
    %132 = math.exp %131 : vector<8x32xf32>
    %cst_44 = arith.constant 1.000000e+00 : f32
    %133 = vector.broadcast %cst_44 : f32 to vector<8x32xf32>
    %134 = arith.addf %133, %132 : vector<8x32xf32>
    %135 = arith.divf %133, %134 : vector<8x32xf32>
    %136 = vector.extract_strided_slice %98 {offsets = [0, 64], sizes = [8, 32], strides = [1, 1]} : vector<8x128xf32> to vector<8x32xf32>
    %137 = math.tanh %136 : vector<8x32xf32>
    %138 = vector.extract_strided_slice %98 {offsets = [0, 96], sizes = [8, 32], strides = [1, 1]} : vector<8x128xf32> to vector<8x32xf32>
    %139 = arith.negf %138 : vector<8x32xf32>
    %140 = math.exp %139 : vector<8x32xf32>
    %cst_45 = arith.constant 1.000000e+00 : f32
    %141 = vector.broadcast %cst_45 : f32 to vector<8x32xf32>
    %142 = arith.addf %141, %140 : vector<8x32xf32>
    %143 = arith.divf %141, %142 : vector<8x32xf32>
    %144 = arith.mulf %135, %73 : vector<8x32xf32>
    %145 = arith.mulf %129, %137 : vector<8x32xf32>
    %146 = arith.addf %144, %145 : vector<8x32xf32>
    %147 = math.tanh %146 : vector<8x32xf32>
    %148 = arith.mulf %143, %147 : vector<8x32xf32>
    %149 = arith.index_cast %c1_i32 : i32 to index
    %c0_46 = arith.constant 0 : index
    %c0_47 = arith.constant 0 : index
    %150 = vector.load %arg5[%149, %c0_46, %c0_47] : memref<8x8x32xf32, #tpu.memory_space<vmem>>, vector<1x8x32xf32>
    %151 = vector.shape_cast %150 : vector<1x8x32xf32> to vector<8x32xf32>
    %152 = vector.shape_cast %123 : vector<8x32xf32> to vector<1x8x32xf32>
    tpu.vector_store %arg5[%149, %c0_46, %c0_47], %152 {strides = array<i32>} : memref<8x8x32xf32, #tpu.memory_space<vmem>>, vector<1x8x32xf32>,
    %153 = arith.index_cast %84 : i32 to index
    %c0_48 = arith.constant 0 : index
    %c0_49 = arith.constant 0 : index
    %154 = vector.load %arg6[%153, %c0_48, %c0_49] : memref<8x8x32xf32, #tpu.memory_space<vmem>>, vector<1x8x32xf32>
    %155 = vector.shape_cast %154 : vector<1x8x32xf32> to vector<8x32xf32>
    %156 = vector.shape_cast %148 : vector<8x32xf32> to vector<1x8x32xf32>
    tpu.vector_store %arg6[%153, %c0_48, %c0_49], %156 {strides = array<i32>} : memref<8x8x32xf32, #tpu.memory_space<vmem>>, vector<1x8x32xf32>,
    %c2_i32 = arith.constant 2 : i32
    %c7_i32_50 = arith.constant 7 : i32
    %157 = arith.subi %c7_i32_50, %c2_i32 : i32
    %c8_i32_51 = arith.constant 8 : i32
    %158 = arith.muli %c2_i32, %c8_i32_51 : i32
    %159 = tpu.assume_multiple %158, 8 : i32
    %c8_i32_52 = arith.constant 8 : i32
    %160 = arith.muli %157, %c8_i32_52 : i32
    %161 = tpu.assume_multiple %160, 8 : i32
    %162 = arith.index_cast %159 : i32 to index
    %c0_53 = arith.constant 0 : index
    %163 = vector.load %arg7[%162, %c0_53] : memref<64x128xf32, #tpu.memory_space<vmem>>, vector<8x128xf32>
    %c0_54 = arith.constant 0 : index
    %c0_55 = arith.constant 0 : index
    %164 = vector.load %arg2[%c0_54, %c0_55] : memref<32x128xf32, #tpu.memory_space<vmem>>, vector<32x128xf32>
    %cst_56 = arith.constant dense<0.000000e+00> : vector<8x128xf32>
    %165 = tpu.matmul %123, %164, %cst_56 {dimension_numbers = #tpu.dot_dimension_numbers<[1], [0], [0], [1], [0, 0, 1, 1], [], []>} : vector<8x32xf32>, vector<32x128xf32>, vector<8x128xf32> -> vector<8x128xf32>
    %166 = arith.addf %163, %165 : vector<8x128xf32>
    %167 = arith.index_cast %161 : i32 to index
    %c0_57 = arith.constant 0 : index
    %168 = vector.load %arg8[%167, %c0_57] : memref<64x128xf32, #tpu.memory_space<vmem>>, vector<8x128xf32>
    %c0_58 = arith.constant 0 : index
    %c0_59 = arith.constant 0 : index
    %169 = vector.load %arg3[%c0_58, %c0_59] : memref<32x128xf32, #tpu.memory_space<vmem>>, vector<32x128xf32>
    %cst_60 = arith.constant dense<0.000000e+00> : vector<8x128xf32>
    %170 = tpu.matmul %148, %169, %cst_60 {dimension_numbers = #tpu.dot_dimension_numbers<[1], [0], [0], [1], [0, 0, 1, 1], [], []>} : vector<8x32xf32>, vector<32x128xf32>, vector<8x128xf32> -> vector<8x128xf32>
    %171 = arith.addf %168, %170 : vector<8x128xf32>
    %172 = vector.extract_strided_slice %166 {offsets = [0, 0], sizes = [8, 32], strides = [1, 1]} : vector<8x128xf32> to vector<8x32xf32>
    %173 = arith.negf %172 : vector<8x32xf32>
    %174 = math.exp %173 : vector<8x32xf32>
    %cst_61 = arith.constant 1.000000e+00 : f32
    %175 = vector.broadcast %cst_61 : f32 to vector<8x32xf32>
    %176 = arith.addf %175, %174 : vector<8x32xf32>
    %177 = arith.divf %175, %176 : vector<8x32xf32>
    %178 = vector.extract_strided_slice %166 {offsets = [0, 32], sizes = [8, 32], strides = [1, 1]} : vector<8x128xf32> to vector<8x32xf32>
    %179 = arith.negf %178 : vector<8x32xf32>
    %180 = math.exp %179 : vector<8x32xf32>
    %cst_62 = arith.constant 1.000000e+00 : f32
    %181 = vector.broadcast %cst_62 : f32 to vector<8x32xf32>
    %182 = arith.addf %181, %180 : vector<8x32xf32>
    %183 = arith.divf %181, %182 : vector<8x32xf32>
    %184 = vector.extract_strided_slice %166 {offsets = [0, 64], sizes = [8, 32], strides = [1, 1]} : vector<8x128xf32> to vector<8x32xf32>
    %185 = math.tanh %184 : vector<8x32xf32>
    %186 = vector.extract_strided_slice %166 {offsets = [0, 96], sizes = [8, 32], strides = [1, 1]} : vector<8x128xf32> to vector<8x32xf32>
    %187 = arith.negf %186 : vector<8x32xf32>
    %188 = math.exp %187 : vector<8x32xf32>
    %cst_63 = arith.constant 1.000000e+00 : f32
    %189 = vector.broadcast %cst_63 : f32 to vector<8x32xf32>
    %190 = arith.addf %189, %188 : vector<8x32xf32>
    %191 = arith.divf %189, %190 : vector<8x32xf32>
    %192 = arith.mulf %183, %121 : vector<8x32xf32>
    %193 = arith.mulf %177, %185 : vector<8x32xf32>
    %194 = arith.addf %192, %193 : vector<8x32xf32>
    %195 = math.tanh %194 : vector<8x32xf32>
    %196 = arith.mulf %191, %195 : vector<8x32xf32>
    %197 = vector.extract_strided_slice %171 {offsets = [0, 0], sizes = [8, 32], strides = [1, 1]} : vector<8x128xf32> to vector<8x32xf32>
    %198 = arith.negf %197 : vector<8x32xf32>
    %199 = math.exp %198 : vector<8x32xf32>
    %cst_64 = arith.constant 1.000000e+00 : f32
    %200 = vector.broadcast %cst_64 : f32 to vector<8x32xf32>
    %201 = arith.addf %200, %199 : vector<8x32xf32>
    %202 = arith.divf %200, %201 : vector<8x32xf32>
    %203 = vector.extract_strided_slice %171 {offsets = [0, 32], sizes = [8, 32], strides = [1, 1]} : vector<8x128xf32> to vector<8x32xf32>
    %204 = arith.negf %203 : vector<8x32xf32>
    %205 = math.exp %204 : vector<8x32xf32>
    %cst_65 = arith.constant 1.000000e+00 : f32
    %206 = vector.broadcast %cst_65 : f32 to vector<8x32xf32>
    %207 = arith.addf %206, %205 : vector<8x32xf32>
    %208 = arith.divf %206, %207 : vector<8x32xf32>
    %209 = vector.extract_strided_slice %171 {offsets = [0, 64], sizes = [8, 32], strides = [1, 1]} : vector<8x128xf32> to vector<8x32xf32>
    %210 = math.tanh %209 : vector<8x32xf32>
    %211 = vector.extract_strided_slice %171 {offsets = [0, 96], sizes = [8, 32], strides = [1, 1]} : vector<8x128xf32> to vector<8x32xf32>
    %212 = arith.negf %211 : vector<8x32xf32>
    %213 = math.exp %212 : vector<8x32xf32>
    %cst_66 = arith.constant 1.000000e+00 : f32
    %214 = vector.broadcast %cst_66 : f32 to vector<8x32xf32>
    %215 = arith.addf %214, %213 : vector<8x32xf32>
    %216 = arith.divf %214, %215 : vector<8x32xf32>
    %217 = arith.mulf %208, %146 : vector<8x32xf32>
    %218 = arith.mulf %202, %210 : vector<8x32xf32>
    %219 = arith.addf %217, %218 : vector<8x32xf32>
    %220 = math.tanh %219 : vector<8x32xf32>
    %221 = arith.mulf %216, %220 : vector<8x32xf32>
    %222 = arith.index_cast %c2_i32 : i32 to index
    %c0_67 = arith.constant 0 : index
    %c0_68 = arith.constant 0 : index
    %223 = vector.load %arg5[%222, %c0_67, %c0_68] : memref<8x8x32xf32, #tpu.memory_space<vmem>>, vector<1x8x32xf32>
    %224 = vector.shape_cast %223 : vector<1x8x32xf32> to vector<8x32xf32>
    %225 = vector.shape_cast %196 : vector<8x32xf32> to vector<1x8x32xf32>
    tpu.vector_store %arg5[%222, %c0_67, %c0_68], %225 {strides = array<i32>} : memref<8x8x32xf32, #tpu.memory_space<vmem>>, vector<1x8x32xf32>,
    %226 = arith.index_cast %157 : i32 to index
    %c0_69 = arith.constant 0 : index
    %c0_70 = arith.constant 0 : index
    %227 = vector.load %arg6[%226, %c0_69, %c0_70] : memref<8x8x32xf32, #tpu.memory_space<vmem>>, vector<1x8x32xf32>
    %228 = vector.shape_cast %227 : vector<1x8x32xf32> to vector<8x32xf32>
    %229 = vector.shape_cast %221 : vector<8x32xf32> to vector<1x8x32xf32>
    tpu.vector_store %arg6[%226, %c0_69, %c0_70], %229 {strides = array<i32>} : memref<8x8x32xf32, #tpu.memory_space<vmem>>, vector<1x8x32xf32>,
    %c3_i32 = arith.constant 3 : i32
    %c7_i32_71 = arith.constant 7 : i32
    %230 = arith.subi %c7_i32_71, %c3_i32 : i32
    %c8_i32_72 = arith.constant 8 : i32
    %231 = arith.muli %c3_i32, %c8_i32_72 : i32
    %232 = tpu.assume_multiple %231, 8 : i32
    %c8_i32_73 = arith.constant 8 : i32
    %233 = arith.muli %230, %c8_i32_73 : i32
    %234 = tpu.assume_multiple %233, 8 : i32
    %235 = arith.index_cast %232 : i32 to index
    %c0_74 = arith.constant 0 : index
    %236 = vector.load %arg7[%235, %c0_74] : memref<64x128xf32, #tpu.memory_space<vmem>>, vector<8x128xf32>
    %c0_75 = arith.constant 0 : index
    %c0_76 = arith.constant 0 : index
    %237 = vector.load %arg2[%c0_75, %c0_76] : memref<32x128xf32, #tpu.memory_space<vmem>>, vector<32x128xf32>
    %cst_77 = arith.constant dense<0.000000e+00> : vector<8x128xf32>
    %238 = tpu.matmul %196, %237, %cst_77 {dimension_numbers = #tpu.dot_dimension_numbers<[1], [0], [0], [1], [0, 0, 1, 1], [], []>} : vector<8x32xf32>, vector<32x128xf32>, vector<8x128xf32> -> vector<8x128xf32>
    %239 = arith.addf %236, %238 : vector<8x128xf32>
    %240 = arith.index_cast %234 : i32 to index
    %c0_78 = arith.constant 0 : index
    %241 = vector.load %arg8[%240, %c0_78] : memref<64x128xf32, #tpu.memory_space<vmem>>, vector<8x128xf32>
    %c0_79 = arith.constant 0 : index
    %c0_80 = arith.constant 0 : index
    %242 = vector.load %arg3[%c0_79, %c0_80] : memref<32x128xf32, #tpu.memory_space<vmem>>, vector<32x128xf32>
    %cst_81 = arith.constant dense<0.000000e+00> : vector<8x128xf32>
    %243 = tpu.matmul %221, %242, %cst_81 {dimension_numbers = #tpu.dot_dimension_numbers<[1], [0], [0], [1], [0, 0, 1, 1], [], []>} : vector<8x32xf32>, vector<32x128xf32>, vector<8x128xf32> -> vector<8x128xf32>
    %244 = arith.addf %241, %243 : vector<8x128xf32>
    %245 = vector.extract_strided_slice %239 {offsets = [0, 0], sizes = [8, 32], strides = [1, 1]} : vector<8x128xf32> to vector<8x32xf32>
    %246 = arith.negf %245 : vector<8x32xf32>
    %247 = math.exp %246 : vector<8x32xf32>
    %cst_82 = arith.constant 1.000000e+00 : f32
    %248 = vector.broadcast %cst_82 : f32 to vector<8x32xf32>
    %249 = arith.addf %248, %247 : vector<8x32xf32>
    %250 = arith.divf %248, %249 : vector<8x32xf32>
    %251 = vector.extract_strided_slice %239 {offsets = [0, 32], sizes = [8, 32], strides = [1, 1]} : vector<8x128xf32> to vector<8x32xf32>
    %252 = arith.negf %251 : vector<8x32xf32>
    %253 = math.exp %252 : vector<8x32xf32>
    %cst_83 = arith.constant 1.000000e+00 : f32
    %254 = vector.broadcast %cst_83 : f32 to vector<8x32xf32>
    %255 = arith.addf %254, %253 : vector<8x32xf32>
    %256 = arith.divf %254, %255 : vector<8x32xf32>
    %257 = vector.extract_strided_slice %239 {offsets = [0, 64], sizes = [8, 32], strides = [1, 1]} : vector<8x128xf32> to vector<8x32xf32>
    %258 = math.tanh %257 : vector<8x32xf32>
    %259 = vector.extract_strided_slice %239 {offsets = [0, 96], sizes = [8, 32], strides = [1, 1]} : vector<8x128xf32> to vector<8x32xf32>
    %260 = arith.negf %259 : vector<8x32xf32>
    %261 = math.exp %260 : vector<8x32xf32>
    %cst_84 = arith.constant 1.000000e+00 : f32
    %262 = vector.broadcast %cst_84 : f32 to vector<8x32xf32>
    %263 = arith.addf %262, %261 : vector<8x32xf32>
    %264 = arith.divf %262, %263 : vector<8x32xf32>
    %265 = arith.mulf %256, %194 : vector<8x32xf32>
    %266 = arith.mulf %250, %258 : vector<8x32xf32>
    %267 = arith.addf %265, %266 : vector<8x32xf32>
    %268 = math.tanh %267 : vector<8x32xf32>
    %269 = arith.mulf %264, %268 : vector<8x32xf32>
    %270 = vector.extract_strided_slice %244 {offsets = [0, 0], sizes = [8, 32], strides = [1, 1]} : vector<8x128xf32> to vector<8x32xf32>
    %271 = arith.negf %270 : vector<8x32xf32>
    %272 = math.exp %271 : vector<8x32xf32>
    %cst_85 = arith.constant 1.000000e+00 : f32
    %273 = vector.broadcast %cst_85 : f32 to vector<8x32xf32>
    %274 = arith.addf %273, %272 : vector<8x32xf32>
    %275 = arith.divf %273, %274 : vector<8x32xf32>
    %276 = vector.extract_strided_slice %244 {offsets = [0, 32], sizes = [8, 32], strides = [1, 1]} : vector<8x128xf32> to vector<8x32xf32>
    %277 = arith.negf %276 : vector<8x32xf32>
    %278 = math.exp %277 : vector<8x32xf32>
    %cst_86 = arith.constant 1.000000e+00 : f32
    %279 = vector.broadcast %cst_86 : f32 to vector<8x32xf32>
    %280 = arith.addf %279, %278 : vector<8x32xf32>
    %281 = arith.divf %279, %280 : vector<8x32xf32>
    %282 = vector.extract_strided_slice %244 {offsets = [0, 64], sizes = [8, 32], strides = [1, 1]} : vector<8x128xf32> to vector<8x32xf32>
    %283 = math.tanh %282 : vector<8x32xf32>
    %284 = vector.extract_strided_slice %244 {offsets = [0, 96], sizes = [8, 32], strides = [1, 1]} : vector<8x128xf32> to vector<8x32xf32>
    %285 = arith.negf %284 : vector<8x32xf32>
    %286 = math.exp %285 : vector<8x32xf32>
    %cst_87 = arith.constant 1.000000e+00 : f32
    %287 = vector.broadcast %cst_87 : f32 to vector<8x32xf32>
    %288 = arith.addf %287, %286 : vector<8x32xf32>
    %289 = arith.divf %287, %288 : vector<8x32xf32>
    %290 = arith.mulf %281, %219 : vector<8x32xf32>
    %291 = arith.mulf %275, %283 : vector<8x32xf32>
    %292 = arith.addf %290, %291 : vector<8x32xf32>
    %293 = math.tanh %292 : vector<8x32xf32>
    %294 = arith.mulf %289, %293 : vector<8x32xf32>
    %295 = arith.index_cast %c3_i32 : i32 to index
    %c0_88 = arith.constant 0 : index
    %c0_89 = arith.constant 0 : index
    %296 = vector.load %arg5[%295, %c0_88, %c0_89] : memref<8x8x32xf32, #tpu.memory_space<vmem>>, vector<1x8x32xf32>
    %297 = vector.shape_cast %296 : vector<1x8x32xf32> to vector<8x32xf32>
    %298 = vector.shape_cast %269 : vector<8x32xf32> to vector<1x8x32xf32>
    tpu.vector_store %arg5[%295, %c0_88, %c0_89], %298 {strides = array<i32>} : memref<8x8x32xf32, #tpu.memory_space<vmem>>, vector<1x8x32xf32>,
    %299 = arith.index_cast %230 : i32 to index
    %c0_90 = arith.constant 0 : index
    %c0_91 = arith.constant 0 : index
    %300 = vector.load %arg6[%299, %c0_90, %c0_91] : memref<8x8x32xf32, #tpu.memory_space<vmem>>, vector<1x8x32xf32>
    %301 = vector.shape_cast %300 : vector<1x8x32xf32> to vector<8x32xf32>
    %302 = vector.shape_cast %294 : vector<8x32xf32> to vector<1x8x32xf32>
    tpu.vector_store %arg6[%299, %c0_90, %c0_91], %302 {strides = array<i32>} : memref<8x8x32xf32, #tpu.memory_space<vmem>>, vector<1x8x32xf32>,
    %c4_i32 = arith.constant 4 : i32
    %c7_i32_92 = arith.constant 7 : i32
    %303 = arith.subi %c7_i32_92, %c4_i32 : i32
    %c8_i32_93 = arith.constant 8 : i32
    %304 = arith.muli %c4_i32, %c8_i32_93 : i32
    %305 = tpu.assume_multiple %304, 8 : i32
    %c8_i32_94 = arith.constant 8 : i32
    %306 = arith.muli %303, %c8_i32_94 : i32
    %307 = tpu.assume_multiple %306, 8 : i32
    %308 = arith.index_cast %305 : i32 to index
    %c0_95 = arith.constant 0 : index
    %309 = vector.load %arg7[%308, %c0_95] : memref<64x128xf32, #tpu.memory_space<vmem>>, vector<8x128xf32>
    %c0_96 = arith.constant 0 : index
    %c0_97 = arith.constant 0 : index
    %310 = vector.load %arg2[%c0_96, %c0_97] : memref<32x128xf32, #tpu.memory_space<vmem>>, vector<32x128xf32>
    %cst_98 = arith.constant dense<0.000000e+00> : vector<8x128xf32>
    %311 = tpu.matmul %269, %310, %cst_98 {dimension_numbers = #tpu.dot_dimension_numbers<[1], [0], [0], [1], [0, 0, 1, 1], [], []>} : vector<8x32xf32>, vector<32x128xf32>, vector<8x128xf32> -> vector<8x128xf32>
    %312 = arith.addf %309, %311 : vector<8x128xf32>
    %313 = arith.index_cast %307 : i32 to index
    %c0_99 = arith.constant 0 : index
    %314 = vector.load %arg8[%313, %c0_99] : memref<64x128xf32, #tpu.memory_space<vmem>>, vector<8x128xf32>
    %c0_100 = arith.constant 0 : index
    %c0_101 = arith.constant 0 : index
    %315 = vector.load %arg3[%c0_100, %c0_101] : memref<32x128xf32, #tpu.memory_space<vmem>>, vector<32x128xf32>
    %cst_102 = arith.constant dense<0.000000e+00> : vector<8x128xf32>
    %316 = tpu.matmul %294, %315, %cst_102 {dimension_numbers = #tpu.dot_dimension_numbers<[1], [0], [0], [1], [0, 0, 1, 1], [], []>} : vector<8x32xf32>, vector<32x128xf32>, vector<8x128xf32> -> vector<8x128xf32>
    %317 = arith.addf %314, %316 : vector<8x128xf32>
    %318 = vector.extract_strided_slice %312 {offsets = [0, 0], sizes = [8, 32], strides = [1, 1]} : vector<8x128xf32> to vector<8x32xf32>
    %319 = arith.negf %318 : vector<8x32xf32>
    %320 = math.exp %319 : vector<8x32xf32>
    %cst_103 = arith.constant 1.000000e+00 : f32
    %321 = vector.broadcast %cst_103 : f32 to vector<8x32xf32>
    %322 = arith.addf %321, %320 : vector<8x32xf32>
    %323 = arith.divf %321, %322 : vector<8x32xf32>
    %324 = vector.extract_strided_slice %312 {offsets = [0, 32], sizes = [8, 32], strides = [1, 1]} : vector<8x128xf32> to vector<8x32xf32>
    %325 = arith.negf %324 : vector<8x32xf32>
    %326 = math.exp %325 : vector<8x32xf32>
    %cst_104 = arith.constant 1.000000e+00 : f32
    %327 = vector.broadcast %cst_104 : f32 to vector<8x32xf32>
    %328 = arith.addf %327, %326 : vector<8x32xf32>
    %329 = arith.divf %327, %328 : vector<8x32xf32>
    %330 = vector.extract_strided_slice %312 {offsets = [0, 64], sizes = [8, 32], strides = [1, 1]} : vector<8x128xf32> to vector<8x32xf32>
    %331 = math.tanh %330 : vector<8x32xf32>
    %332 = vector.extract_strided_slice %312 {offsets = [0, 96], sizes = [8, 32], strides = [1, 1]} : vector<8x128xf32> to vector<8x32xf32>
    %333 = arith.negf %332 : vector<8x32xf32>
    %334 = math.exp %333 : vector<8x32xf32>
    %cst_105 = arith.constant 1.000000e+00 : f32
    %335 = vector.broadcast %cst_105 : f32 to vector<8x32xf32>
    %336 = arith.addf %335, %334 : vector<8x32xf32>
    %337 = arith.divf %335, %336 : vector<8x32xf32>
    %338 = arith.mulf %329, %267 : vector<8x32xf32>
    %339 = arith.mulf %323, %331 : vector<8x32xf32>
    %340 = arith.addf %338, %339 : vector<8x32xf32>
    %341 = math.tanh %340 : vector<8x32xf32>
    %342 = arith.mulf %337, %341 : vector<8x32xf32>
    %343 = vector.extract_strided_slice %317 {offsets = [0, 0], sizes = [8, 32], strides = [1, 1]} : vector<8x128xf32> to vector<8x32xf32>
    %344 = arith.negf %343 : vector<8x32xf32>
    %345 = math.exp %344 : vector<8x32xf32>
    %cst_106 = arith.constant 1.000000e+00 : f32
    %346 = vector.broadcast %cst_106 : f32 to vector<8x32xf32>
    %347 = arith.addf %346, %345 : vector<8x32xf32>
    %348 = arith.divf %346, %347 : vector<8x32xf32>
    %349 = vector.extract_strided_slice %317 {offsets = [0, 32], sizes = [8, 32], strides = [1, 1]} : vector<8x128xf32> to vector<8x32xf32>
    %350 = arith.negf %349 : vector<8x32xf32>
    %351 = math.exp %350 : vector<8x32xf32>
    %cst_107 = arith.constant 1.000000e+00 : f32
    %352 = vector.broadcast %cst_107 : f32 to vector<8x32xf32>
    %353 = arith.addf %352, %351 : vector<8x32xf32>
    %354 = arith.divf %352, %353 : vector<8x32xf32>
    %355 = vector.extract_strided_slice %317 {offsets = [0, 64], sizes = [8, 32], strides = [1, 1]} : vector<8x128xf32> to vector<8x32xf32>
    %356 = math.tanh %355 : vector<8x32xf32>
    %357 = vector.extract_strided_slice %317 {offsets = [0, 96], sizes = [8, 32], strides = [1, 1]} : vector<8x128xf32> to vector<8x32xf32>
    %358 = arith.negf %357 : vector<8x32xf32>
    %359 = math.exp %358 : vector<8x32xf32>
    %cst_108 = arith.constant 1.000000e+00 : f32
    %360 = vector.broadcast %cst_108 : f32 to vector<8x32xf32>
    %361 = arith.addf %360, %359 : vector<8x32xf32>
    %362 = arith.divf %360, %361 : vector<8x32xf32>
    %363 = arith.mulf %354, %292 : vector<8x32xf32>
    %364 = arith.mulf %348, %356 : vector<8x32xf32>
    %365 = arith.addf %363, %364 : vector<8x32xf32>
    %366 = math.tanh %365 : vector<8x32xf32>
    %367 = arith.mulf %362, %366 : vector<8x32xf32>
    %368 = arith.index_cast %c4_i32 : i32 to index
    %c0_109 = arith.constant 0 : index
    %c0_110 = arith.constant 0 : index
    %369 = vector.load %arg5[%368, %c0_109, %c0_110] : memref<8x8x32xf32, #tpu.memory_space<vmem>>, vector<1x8x32xf32>
    %370 = vector.shape_cast %369 : vector<1x8x32xf32> to vector<8x32xf32>
    %371 = vector.shape_cast %342 : vector<8x32xf32> to vector<1x8x32xf32>
    tpu.vector_store %arg5[%368, %c0_109, %c0_110], %371 {strides = array<i32>} : memref<8x8x32xf32, #tpu.memory_space<vmem>>, vector<1x8x32xf32>,
    %372 = arith.index_cast %303 : i32 to index
    %c0_111 = arith.constant 0 : index
    %c0_112 = arith.constant 0 : index
    %373 = vector.load %arg6[%372, %c0_111, %c0_112] : memref<8x8x32xf32, #tpu.memory_space<vmem>>, vector<1x8x32xf32>
    %374 = vector.shape_cast %373 : vector<1x8x32xf32> to vector<8x32xf32>
    %375 = vector.shape_cast %367 : vector<8x32xf32> to vector<1x8x32xf32>
    tpu.vector_store %arg6[%372, %c0_111, %c0_112], %375 {strides = array<i32>} : memref<8x8x32xf32, #tpu.memory_space<vmem>>, vector<1x8x32xf32>,
    %c5_i32 = arith.constant 5 : i32
    %c7_i32_113 = arith.constant 7 : i32
    %376 = arith.subi %c7_i32_113, %c5_i32 : i32
    %c8_i32_114 = arith.constant 8 : i32
    %377 = arith.muli %c5_i32, %c8_i32_114 : i32
    %378 = tpu.assume_multiple %377, 8 : i32
    %c8_i32_115 = arith.constant 8 : i32
    %379 = arith.muli %376, %c8_i32_115 : i32
    %380 = tpu.assume_multiple %379, 8 : i32
    %381 = arith.index_cast %378 : i32 to index
    %c0_116 = arith.constant 0 : index
    %382 = vector.load %arg7[%381, %c0_116] : memref<64x128xf32, #tpu.memory_space<vmem>>, vector<8x128xf32>
    %c0_117 = arith.constant 0 : index
    %c0_118 = arith.constant 0 : index
    %383 = vector.load %arg2[%c0_117, %c0_118] : memref<32x128xf32, #tpu.memory_space<vmem>>, vector<32x128xf32>
    %cst_119 = arith.constant dense<0.000000e+00> : vector<8x128xf32>
    %384 = tpu.matmul %342, %383, %cst_119 {dimension_numbers = #tpu.dot_dimension_numbers<[1], [0], [0], [1], [0, 0, 1, 1], [], []>} : vector<8x32xf32>, vector<32x128xf32>, vector<8x128xf32> -> vector<8x128xf32>
    %385 = arith.addf %382, %384 : vector<8x128xf32>
    %386 = arith.index_cast %380 : i32 to index
    %c0_120 = arith.constant 0 : index
    %387 = vector.load %arg8[%386, %c0_120] : memref<64x128xf32, #tpu.memory_space<vmem>>, vector<8x128xf32>
    %c0_121 = arith.constant 0 : index
    %c0_122 = arith.constant 0 : index
    %388 = vector.load %arg3[%c0_121, %c0_122] : memref<32x128xf32, #tpu.memory_space<vmem>>, vector<32x128xf32>
    %cst_123 = arith.constant dense<0.000000e+00> : vector<8x128xf32>
    %389 = tpu.matmul %367, %388, %cst_123 {dimension_numbers = #tpu.dot_dimension_numbers<[1], [0], [0], [1], [0, 0, 1, 1], [], []>} : vector<8x32xf32>, vector<32x128xf32>, vector<8x128xf32> -> vector<8x128xf32>
    %390 = arith.addf %387, %389 : vector<8x128xf32>
    %391 = vector.extract_strided_slice %385 {offsets = [0, 0], sizes = [8, 32], strides = [1, 1]} : vector<8x128xf32> to vector<8x32xf32>
    %392 = arith.negf %391 : vector<8x32xf32>
    %393 = math.exp %392 : vector<8x32xf32>
    %cst_124 = arith.constant 1.000000e+00 : f32
    %394 = vector.broadcast %cst_124 : f32 to vector<8x32xf32>
    %395 = arith.addf %394, %393 : vector<8x32xf32>
    %396 = arith.divf %394, %395 : vector<8x32xf32>
    %397 = vector.extract_strided_slice %385 {offsets = [0, 32], sizes = [8, 32], strides = [1, 1]} : vector<8x128xf32> to vector<8x32xf32>
    %398 = arith.negf %397 : vector<8x32xf32>
    %399 = math.exp %398 : vector<8x32xf32>
    %cst_125 = arith.constant 1.000000e+00 : f32
    %400 = vector.broadcast %cst_125 : f32 to vector<8x32xf32>
    %401 = arith.addf %400, %399 : vector<8x32xf32>
    %402 = arith.divf %400, %401 : vector<8x32xf32>
    %403 = vector.extract_strided_slice %385 {offsets = [0, 64], sizes = [8, 32], strides = [1, 1]} : vector<8x128xf32> to vector<8x32xf32>
    %404 = math.tanh %403 : vector<8x32xf32>
    %405 = vector.extract_strided_slice %385 {offsets = [0, 96], sizes = [8, 32], strides = [1, 1]} : vector<8x128xf32> to vector<8x32xf32>
    %406 = arith.negf %405 : vector<8x32xf32>
    %407 = math.exp %406 : vector<8x32xf32>
    %cst_126 = arith.constant 1.000000e+00 : f32
    %408 = vector.broadcast %cst_126 : f32 to vector<8x32xf32>
    %409 = arith.addf %408, %407 : vector<8x32xf32>
    %410 = arith.divf %408, %409 : vector<8x32xf32>
    %411 = arith.mulf %402, %340 : vector<8x32xf32>
    %412 = arith.mulf %396, %404 : vector<8x32xf32>
    %413 = arith.addf %411, %412 : vector<8x32xf32>
    %414 = math.tanh %413 : vector<8x32xf32>
    %415 = arith.mulf %410, %414 : vector<8x32xf32>
    %416 = vector.extract_strided_slice %390 {offsets = [0, 0], sizes = [8, 32], strides = [1, 1]} : vector<8x128xf32> to vector<8x32xf32>
    %417 = arith.negf %416 : vector<8x32xf32>
    %418 = math.exp %417 : vector<8x32xf32>
    %cst_127 = arith.constant 1.000000e+00 : f32
    %419 = vector.broadcast %cst_127 : f32 to vector<8x32xf32>
    %420 = arith.addf %419, %418 : vector<8x32xf32>
    %421 = arith.divf %419, %420 : vector<8x32xf32>
    %422 = vector.extract_strided_slice %390 {offsets = [0, 32], sizes = [8, 32], strides = [1, 1]} : vector<8x128xf32> to vector<8x32xf32>
    %423 = arith.negf %422 : vector<8x32xf32>
    %424 = math.exp %423 : vector<8x32xf32>
    %cst_128 = arith.constant 1.000000e+00 : f32
    %425 = vector.broadcast %cst_128 : f32 to vector<8x32xf32>
    %426 = arith.addf %425, %424 : vector<8x32xf32>
    %427 = arith.divf %425, %426 : vector<8x32xf32>
    %428 = vector.extract_strided_slice %390 {offsets = [0, 64], sizes = [8, 32], strides = [1, 1]} : vector<8x128xf32> to vector<8x32xf32>
    %429 = math.tanh %428 : vector<8x32xf32>
    %430 = vector.extract_strided_slice %390 {offsets = [0, 96], sizes = [8, 32], strides = [1, 1]} : vector<8x128xf32> to vector<8x32xf32>
    %431 = arith.negf %430 : vector<8x32xf32>
    %432 = math.exp %431 : vector<8x32xf32>
    %cst_129 = arith.constant 1.000000e+00 : f32
    %433 = vector.broadcast %cst_129 : f32 to vector<8x32xf32>
    %434 = arith.addf %433, %432 : vector<8x32xf32>
    %435 = arith.divf %433, %434 : vector<8x32xf32>
    %436 = arith.mulf %427, %365 : vector<8x32xf32>
    %437 = arith.mulf %421, %429 : vector<8x32xf32>
    %438 = arith.addf %436, %437 : vector<8x32xf32>
    %439 = math.tanh %438 : vector<8x32xf32>
    %440 = arith.mulf %435, %439 : vector<8x32xf32>
    %441 = arith.index_cast %c5_i32 : i32 to index
    %c0_130 = arith.constant 0 : index
    %c0_131 = arith.constant 0 : index
    %442 = vector.load %arg5[%441, %c0_130, %c0_131] : memref<8x8x32xf32, #tpu.memory_space<vmem>>, vector<1x8x32xf32>
    %443 = vector.shape_cast %442 : vector<1x8x32xf32> to vector<8x32xf32>
    %444 = vector.shape_cast %415 : vector<8x32xf32> to vector<1x8x32xf32>
    tpu.vector_store %arg5[%441, %c0_130, %c0_131], %444 {strides = array<i32>} : memref<8x8x32xf32, #tpu.memory_space<vmem>>, vector<1x8x32xf32>,
    %445 = arith.index_cast %376 : i32 to index
    %c0_132 = arith.constant 0 : index
    %c0_133 = arith.constant 0 : index
    %446 = vector.load %arg6[%445, %c0_132, %c0_133] : memref<8x8x32xf32, #tpu.memory_space<vmem>>, vector<1x8x32xf32>
    %447 = vector.shape_cast %446 : vector<1x8x32xf32> to vector<8x32xf32>
    %448 = vector.shape_cast %440 : vector<8x32xf32> to vector<1x8x32xf32>
    tpu.vector_store %arg6[%445, %c0_132, %c0_133], %448 {strides = array<i32>} : memref<8x8x32xf32, #tpu.memory_space<vmem>>, vector<1x8x32xf32>,
    %c6_i32 = arith.constant 6 : i32
    %c7_i32_134 = arith.constant 7 : i32
    %449 = arith.subi %c7_i32_134, %c6_i32 : i32
    %c8_i32_135 = arith.constant 8 : i32
    %450 = arith.muli %c6_i32, %c8_i32_135 : i32
    %451 = tpu.assume_multiple %450, 8 : i32
    %c8_i32_136 = arith.constant 8 : i32
    %452 = arith.muli %449, %c8_i32_136 : i32
    %453 = tpu.assume_multiple %452, 8 : i32
    %454 = arith.index_cast %451 : i32 to index
    %c0_137 = arith.constant 0 : index
    %455 = vector.load %arg7[%454, %c0_137] : memref<64x128xf32, #tpu.memory_space<vmem>>, vector<8x128xf32>
    %c0_138 = arith.constant 0 : index
    %c0_139 = arith.constant 0 : index
    %456 = vector.load %arg2[%c0_138, %c0_139] : memref<32x128xf32, #tpu.memory_space<vmem>>, vector<32x128xf32>
    %cst_140 = arith.constant dense<0.000000e+00> : vector<8x128xf32>
    %457 = tpu.matmul %415, %456, %cst_140 {dimension_numbers = #tpu.dot_dimension_numbers<[1], [0], [0], [1], [0, 0, 1, 1], [], []>} : vector<8x32xf32>, vector<32x128xf32>, vector<8x128xf32> -> vector<8x128xf32>
    %458 = arith.addf %455, %457 : vector<8x128xf32>
    %459 = arith.index_cast %453 : i32 to index
    %c0_141 = arith.constant 0 : index
    %460 = vector.load %arg8[%459, %c0_141] : memref<64x128xf32, #tpu.memory_space<vmem>>, vector<8x128xf32>
    %c0_142 = arith.constant 0 : index
    %c0_143 = arith.constant 0 : index
    %461 = vector.load %arg3[%c0_142, %c0_143] : memref<32x128xf32, #tpu.memory_space<vmem>>, vector<32x128xf32>
    %cst_144 = arith.constant dense<0.000000e+00> : vector<8x128xf32>
    %462 = tpu.matmul %440, %461, %cst_144 {dimension_numbers = #tpu.dot_dimension_numbers<[1], [0], [0], [1], [0, 0, 1, 1], [], []>} : vector<8x32xf32>, vector<32x128xf32>, vector<8x128xf32> -> vector<8x128xf32>
    %463 = arith.addf %460, %462 : vector<8x128xf32>
    %464 = vector.extract_strided_slice %458 {offsets = [0, 0], sizes = [8, 32], strides = [1, 1]} : vector<8x128xf32> to vector<8x32xf32>
    %465 = arith.negf %464 : vector<8x32xf32>
    %466 = math.exp %465 : vector<8x32xf32>
    %cst_145 = arith.constant 1.000000e+00 : f32
    %467 = vector.broadcast %cst_145 : f32 to vector<8x32xf32>
    %468 = arith.addf %467, %466 : vector<8x32xf32>
    %469 = arith.divf %467, %468 : vector<8x32xf32>
    %470 = vector.extract_strided_slice %458 {offsets = [0, 32], sizes = [8, 32], strides = [1, 1]} : vector<8x128xf32> to vector<8x32xf32>
    %471 = arith.negf %470 : vector<8x32xf32>
    %472 = math.exp %471 : vector<8x32xf32>
    %cst_146 = arith.constant 1.000000e+00 : f32
    %473 = vector.broadcast %cst_146 : f32 to vector<8x32xf32>
    %474 = arith.addf %473, %472 : vector<8x32xf32>
    %475 = arith.divf %473, %474 : vector<8x32xf32>
    %476 = vector.extract_strided_slice %458 {offsets = [0, 64], sizes = [8, 32], strides = [1, 1]} : vector<8x128xf32> to vector<8x32xf32>
    %477 = math.tanh %476 : vector<8x32xf32>
    %478 = vector.extract_strided_slice %458 {offsets = [0, 96], sizes = [8, 32], strides = [1, 1]} : vector<8x128xf32> to vector<8x32xf32>
    %479 = arith.negf %478 : vector<8x32xf32>
    %480 = math.exp %479 : vector<8x32xf32>
    %cst_147 = arith.constant 1.000000e+00 : f32
    %481 = vector.broadcast %cst_147 : f32 to vector<8x32xf32>
    %482 = arith.addf %481, %480 : vector<8x32xf32>
    %483 = arith.divf %481, %482 : vector<8x32xf32>
    %484 = arith.mulf %475, %413 : vector<8x32xf32>
    %485 = arith.mulf %469, %477 : vector<8x32xf32>
    %486 = arith.addf %484, %485 : vector<8x32xf32>
    %487 = math.tanh %486 : vector<8x32xf32>
    %488 = arith.mulf %483, %487 : vector<8x32xf32>
    %489 = vector.extract_strided_slice %463 {offsets = [0, 0], sizes = [8, 32], strides = [1, 1]} : vector<8x128xf32> to vector<8x32xf32>
    %490 = arith.negf %489 : vector<8x32xf32>
    %491 = math.exp %490 : vector<8x32xf32>
    %cst_148 = arith.constant 1.000000e+00 : f32
    %492 = vector.broadcast %cst_148 : f32 to vector<8x32xf32>
    %493 = arith.addf %492, %491 : vector<8x32xf32>
    %494 = arith.divf %492, %493 : vector<8x32xf32>
    %495 = vector.extract_strided_slice %463 {offsets = [0, 32], sizes = [8, 32], strides = [1, 1]} : vector<8x128xf32> to vector<8x32xf32>
    %496 = arith.negf %495 : vector<8x32xf32>
    %497 = math.exp %496 : vector<8x32xf32>
    %cst_149 = arith.constant 1.000000e+00 : f32
    %498 = vector.broadcast %cst_149 : f32 to vector<8x32xf32>
    %499 = arith.addf %498, %497 : vector<8x32xf32>
    %500 = arith.divf %498, %499 : vector<8x32xf32>
    %501 = vector.extract_strided_slice %463 {offsets = [0, 64], sizes = [8, 32], strides = [1, 1]} : vector<8x128xf32> to vector<8x32xf32>
    %502 = math.tanh %501 : vector<8x32xf32>
    %503 = vector.extract_strided_slice %463 {offsets = [0, 96], sizes = [8, 32], strides = [1, 1]} : vector<8x128xf32> to vector<8x32xf32>
    %504 = arith.negf %503 : vector<8x32xf32>
    %505 = math.exp %504 : vector<8x32xf32>
    %cst_150 = arith.constant 1.000000e+00 : f32
    %506 = vector.broadcast %cst_150 : f32 to vector<8x32xf32>
    %507 = arith.addf %506, %505 : vector<8x32xf32>
    %508 = arith.divf %506, %507 : vector<8x32xf32>
    %509 = arith.mulf %500, %438 : vector<8x32xf32>
    %510 = arith.mulf %494, %502 : vector<8x32xf32>
    %511 = arith.addf %509, %510 : vector<8x32xf32>
    %512 = math.tanh %511 : vector<8x32xf32>
    %513 = arith.mulf %508, %512 : vector<8x32xf32>
    %514 = arith.index_cast %c6_i32 : i32 to index
    %c0_151 = arith.constant 0 : index
    %c0_152 = arith.constant 0 : index
    %515 = vector.load %arg5[%514, %c0_151, %c0_152] : memref<8x8x32xf32, #tpu.memory_space<vmem>>, vector<1x8x32xf32>
    %516 = vector.shape_cast %515 : vector<1x8x32xf32> to vector<8x32xf32>
    %517 = vector.shape_cast %488 : vector<8x32xf32> to vector<1x8x32xf32>
    tpu.vector_store %arg5[%514, %c0_151, %c0_152], %517 {strides = array<i32>} : memref<8x8x32xf32, #tpu.memory_space<vmem>>, vector<1x8x32xf32>,
    %518 = arith.index_cast %449 : i32 to index
    %c0_153 = arith.constant 0 : index
    %c0_154 = arith.constant 0 : index
    %519 = vector.load %arg6[%518, %c0_153, %c0_154] : memref<8x8x32xf32, #tpu.memory_space<vmem>>, vector<1x8x32xf32>
    %520 = vector.shape_cast %519 : vector<1x8x32xf32> to vector<8x32xf32>
    %521 = vector.shape_cast %513 : vector<8x32xf32> to vector<1x8x32xf32>
    tpu.vector_store %arg6[%518, %c0_153, %c0_154], %521 {strides = array<i32>} : memref<8x8x32xf32, #tpu.memory_space<vmem>>, vector<1x8x32xf32>,
    %c7_i32_155 = arith.constant 7 : i32
    %c7_i32_156 = arith.constant 7 : i32
    %522 = arith.subi %c7_i32_156, %c7_i32_155 : i32
    %c8_i32_157 = arith.constant 8 : i32
    %523 = arith.muli %c7_i32_155, %c8_i32_157 : i32
    %524 = tpu.assume_multiple %523, 8 : i32
    %c8_i32_158 = arith.constant 8 : i32
    %525 = arith.muli %522, %c8_i32_158 : i32
    %526 = tpu.assume_multiple %525, 8 : i32
    %527 = arith.index_cast %524 : i32 to index
    %c0_159 = arith.constant 0 : index
    %528 = vector.load %arg7[%527, %c0_159] : memref<64x128xf32, #tpu.memory_space<vmem>>, vector<8x128xf32>
    %c0_160 = arith.constant 0 : index
    %c0_161 = arith.constant 0 : index
    %529 = vector.load %arg2[%c0_160, %c0_161] : memref<32x128xf32, #tpu.memory_space<vmem>>, vector<32x128xf32>
    %cst_162 = arith.constant dense<0.000000e+00> : vector<8x128xf32>
    %530 = tpu.matmul %488, %529, %cst_162 {dimension_numbers = #tpu.dot_dimension_numbers<[1], [0], [0], [1], [0, 0, 1, 1], [], []>} : vector<8x32xf32>, vector<32x128xf32>, vector<8x128xf32> -> vector<8x128xf32>
    %531 = arith.addf %528, %530 : vector<8x128xf32>
    %532 = arith.index_cast %526 : i32 to index
    %c0_163 = arith.constant 0 : index
    %533 = vector.load %arg8[%532, %c0_163] : memref<64x128xf32, #tpu.memory_space<vmem>>, vector<8x128xf32>
    %c0_164 = arith.constant 0 : index
    %c0_165 = arith.constant 0 : index
    %534 = vector.load %arg3[%c0_164, %c0_165] : memref<32x128xf32, #tpu.memory_space<vmem>>, vector<32x128xf32>
    %cst_166 = arith.constant dense<0.000000e+00> : vector<8x128xf32>
    %535 = tpu.matmul %513, %534, %cst_166 {dimension_numbers = #tpu.dot_dimension_numbers<[1], [0], [0], [1], [0, 0, 1, 1], [], []>} : vector<8x32xf32>, vector<32x128xf32>, vector<8x128xf32> -> vector<8x128xf32>
    %536 = arith.addf %533, %535 : vector<8x128xf32>
    %537 = vector.extract_strided_slice %531 {offsets = [0, 0], sizes = [8, 32], strides = [1, 1]} : vector<8x128xf32> to vector<8x32xf32>
    %538 = arith.negf %537 : vector<8x32xf32>
    %539 = math.exp %538 : vector<8x32xf32>
    %cst_167 = arith.constant 1.000000e+00 : f32
    %540 = vector.broadcast %cst_167 : f32 to vector<8x32xf32>
    %541 = arith.addf %540, %539 : vector<8x32xf32>
    %542 = arith.divf %540, %541 : vector<8x32xf32>
    %543 = vector.extract_strided_slice %531 {offsets = [0, 32], sizes = [8, 32], strides = [1, 1]} : vector<8x128xf32> to vector<8x32xf32>
    %544 = arith.negf %543 : vector<8x32xf32>
    %545 = math.exp %544 : vector<8x32xf32>
    %cst_168 = arith.constant 1.000000e+00 : f32
    %546 = vector.broadcast %cst_168 : f32 to vector<8x32xf32>
    %547 = arith.addf %546, %545 : vector<8x32xf32>
    %548 = arith.divf %546, %547 : vector<8x32xf32>
    %549 = vector.extract_strided_slice %531 {offsets = [0, 64], sizes = [8, 32], strides = [1, 1]} : vector<8x128xf32> to vector<8x32xf32>
    %550 = math.tanh %549 : vector<8x32xf32>
    %551 = vector.extract_strided_slice %531 {offsets = [0, 96], sizes = [8, 32], strides = [1, 1]} : vector<8x128xf32> to vector<8x32xf32>
    %552 = arith.negf %551 : vector<8x32xf32>
    %553 = math.exp %552 : vector<8x32xf32>
    %cst_169 = arith.constant 1.000000e+00 : f32
    %554 = vector.broadcast %cst_169 : f32 to vector<8x32xf32>
    %555 = arith.addf %554, %553 : vector<8x32xf32>
    %556 = arith.divf %554, %555 : vector<8x32xf32>
    %557 = arith.mulf %548, %486 : vector<8x32xf32>
    %558 = arith.mulf %542, %550 : vector<8x32xf32>
    %559 = arith.addf %557, %558 : vector<8x32xf32>
    %560 = math.tanh %559 : vector<8x32xf32>
    %561 = arith.mulf %556, %560 : vector<8x32xf32>
    %562 = vector.extract_strided_slice %536 {offsets = [0, 0], sizes = [8, 32], strides = [1, 1]} : vector<8x128xf32> to vector<8x32xf32>
    %563 = arith.negf %562 : vector<8x32xf32>
    %564 = math.exp %563 : vector<8x32xf32>
    %cst_170 = arith.constant 1.000000e+00 : f32
    %565 = vector.broadcast %cst_170 : f32 to vector<8x32xf32>
    %566 = arith.addf %565, %564 : vector<8x32xf32>
    %567 = arith.divf %565, %566 : vector<8x32xf32>
    %568 = vector.extract_strided_slice %536 {offsets = [0, 32], sizes = [8, 32], strides = [1, 1]} : vector<8x128xf32> to vector<8x32xf32>
    %569 = arith.negf %568 : vector<8x32xf32>
    %570 = math.exp %569 : vector<8x32xf32>
    %cst_171 = arith.constant 1.000000e+00 : f32
    %571 = vector.broadcast %cst_171 : f32 to vector<8x32xf32>
    %572 = arith.addf %571, %570 : vector<8x32xf32>
    %573 = arith.divf %571, %572 : vector<8x32xf32>
    %574 = vector.extract_strided_slice %536 {offsets = [0, 64], sizes = [8, 32], strides = [1, 1]} : vector<8x128xf32> to vector<8x32xf32>
    %575 = math.tanh %574 : vector<8x32xf32>
    %576 = vector.extract_strided_slice %536 {offsets = [0, 96], sizes = [8, 32], strides = [1, 1]} : vector<8x128xf32> to vector<8x32xf32>
    %577 = arith.negf %576 : vector<8x32xf32>
    %578 = math.exp %577 : vector<8x32xf32>
    %cst_172 = arith.constant 1.000000e+00 : f32
    %579 = vector.broadcast %cst_172 : f32 to vector<8x32xf32>
    %580 = arith.addf %579, %578 : vector<8x32xf32>
    %581 = arith.divf %579, %580 : vector<8x32xf32>
    %582 = arith.mulf %573, %511 : vector<8x32xf32>
    %583 = arith.mulf %567, %575 : vector<8x32xf32>
    %584 = arith.addf %582, %583 : vector<8x32xf32>
    %585 = math.tanh %584 : vector<8x32xf32>
    %586 = arith.mulf %581, %585 : vector<8x32xf32>
    %587 = arith.index_cast %c7_i32_155 : i32 to index
    %c0_173 = arith.constant 0 : index
    %c0_174 = arith.constant 0 : index
    %588 = vector.load %arg5[%587, %c0_173, %c0_174] : memref<8x8x32xf32, #tpu.memory_space<vmem>>, vector<1x8x32xf32>
    %589 = vector.shape_cast %588 : vector<1x8x32xf32> to vector<8x32xf32>
    %590 = vector.shape_cast %561 : vector<8x32xf32> to vector<1x8x32xf32>
    tpu.vector_store %arg5[%587, %c0_173, %c0_174], %590 {strides = array<i32>} : memref<8x8x32xf32, #tpu.memory_space<vmem>>, vector<1x8x32xf32>,
    %591 = arith.index_cast %522 : i32 to index
    %c0_175 = arith.constant 0 : index
    %c0_176 = arith.constant 0 : index
    %592 = vector.load %arg6[%591, %c0_175, %c0_176] : memref<8x8x32xf32, #tpu.memory_space<vmem>>, vector<1x8x32xf32>
    %593 = vector.shape_cast %592 : vector<1x8x32xf32> to vector<8x32xf32>
    %594 = vector.shape_cast %586 : vector<8x32xf32> to vector<1x8x32xf32>
    tpu.vector_store %arg6[%591, %c0_175, %c0_176], %594 {strides = array<i32>} : memref<8x8x32xf32, #tpu.memory_space<vmem>>, vector<1x8x32xf32>,
    %c8_i32_177 = arith.constant 8 : i32
    return
  }
}

</mosaic_0001>

<bundles_post_ra>
// kernel: tpu_custom_call.1
= control target key start
LH: loop header
LB: loop body
LE: loop exit
PB: predicated region body
PF: predicated region fallthrough
CT: control target
= control target key end

     0   :  { %12 = vsyncpa [#allocation5], 0  ;;  %s2981_s0 = inlined_call_operand.vmem [shape: f32[64,16], index: 0, kind: input, shape index: {}]   ;;  %s2982_s1 = inlined_call_operand.vmem [shape: f32[16,256], index: 1, kind: input, shape index: {}]   ;;  %s2983_s2 = inlined_call_operand.vmem [shape: f32[32,128], index: 2, kind: input, shape index: {}]   ;;  %s2984_s3 = inlined_call_operand.hbm [shape: f32[32,128], index: 3, kind: input, shape index: {}]   ;;  %s2985_s4 = inlined_call_operand.vmem [shape: f32[1,256], index: 4, kind: input, shape index: {}]   ;;  %s2986_s5 = inlined_call_operand.hbm [shape: f32[8,8,32], index: 5, kind: output, shape index: {0}]   ;;  %s2987_s6 = inlined_call_operand.hbm [shape: f32[8,8,32], index: 6, kind: output, shape index: {1}]  }
   0x1   :  { %13 = vsyncpa [#allocation6], 0 }
   0x2   :  { %14 = vsyncpa [#allocation9], 0  ;;  %s2486_s21 = smov [#allocation4]  }
   0x3   :  { %s26_s22 = sshll.u32 %s2486_s21, 4  ;;  %s27_s22 = int_to_ptr.vmem [resolvable:$true] %s26_s22 }
   0x4   :  { %s2428_s23 = scalar_lea.vmem %s27_s22, 512  ;;  %p2433_p1 = scmp.lt.s32.totalorder %s27_s22, %s27_s22 }
   0x5   :  { %p2429_p0 = scmp.ne.s32.totalorder %s27_s22, %s2428_s23  ;;  %p2434_p2 = scmp.lt.s32.totalorder %s2428_s23, %s2428_s23 }
   0x7   :  { %p2435_p3 = por %p2434_p2, %p2433_p1 }
   0x9   :  { %p2436_p4 = pnand %p2435_p3, %p2429_p0 }
   0xb   :  { %2439 = shalt.err (!%p2436_p4)
}
   0xc   :  { %s2487_s24 = smov 128   ;;  %s2488_s25 = smov 8  }
   0xd   :  { %32 = dma.hbm_to_vmem [thread:$0]  %s2984_s3, 512, %s27_s22, [#allocation5], %s2487_s24, %s2487_s24, %s2488_s25  }
   0xe   :  { %2480 = dma.done.wait [#allocation5], 512  }
   0xf   :  { %2481 = vsyncadd [#allocation5], 4294966784  ;;  %v2489_v0 = vmov 0.0   ;;  %vm2490_vm0 = vmmov 0   ;;  %v49_v1 = vld [vmem:[%s2982_s1 + $0x18] sm:$0xff]  ;;  %v48_v3 = vld [vmem:[%s2982_s1 + $0x10] sm:$0xff]  ;;  %v52_v21 = vlaneseq }
  0x10   :  { %2107 = vmatprep.subr.mxu1 %v2489_v0  ;;  %151 = vmatprep.mubr.f32.mxu0 %v2489_v0  ;;  %v2546_v2 = vld [vmem:[%s2983_s2 + $0x18] sm:$0xff]  ;;  %v47_v4 = vld [vmem:[%s2982_s1 + $0x8] sm:$0xff]  ;;  %v2558_v5 = vld [vmem:[%s2983_s2 + $0x10] sm:$0xff]  ;;  %vm62_vm1 = vcmask 130048   ;;  %vm221_vm2 = vcmask 261120  }
  0x11   :  { %2115 = vmatprep.mubr.msk.f32.mxu1 %vm2490_vm0, %v2489_v0  ;;  %115 = vmatprep.subr.mxu0 %v49_v1  ;;  %v46_v6 = vld [vmem:[%s2982_s1] sm:$0xff]  ;;  %v2570_v8 = vld [vmem:[%s2983_s2 + $0x8] sm:$0xff]  ;;  %v2586_v11 = vld [vmem:[#allocation4 + $0x18] sm:$0xff]  ;;  %v53_v22 = vshrl.u32 %v52_v21, 7 }
  0x12   :  { %2108 = vmatpush3.msra.mxu1 %v2546_v2  ;;  %116 = vmatpush1.msra.mxu0 %v48_v3  ;;  %v38_v7 = vld [vmem:[%s2981_s0] sm:$0xff]  ;;  %v39_v10 = vld [vmem:[%s2981_s0 + $0x8] sm:$0xff]  ;;  %v2592_v12 = vld [vmem:[#allocation4 + $0x10] sm:$0xff] }
  0x13   :  { %2109 = vmatprep.subr.mxu1 %v2489_v0  ;;  %117 = vmatprep.subr.mxu0 %v47_v4  ;;  %v2577_v9 = vld [vmem:[%s2983_s2] sm:$0xff]  ;;  %v40_v13 = vld [vmem:[%s2981_s0 + $0x10] sm:$0xff]  ;;  %v2601_v14 = vld [vmem:[#allocation4 + $0x8] sm:$0xff]  ;;  %v54_v23 = vsub.s32 0, %v53_v22  ;;  %v58_v25 = vsub.s32 1, %v53_v22 }
  0x14   :  { %2110 = vmatpush3.msra.mxu1 %v2558_v5  ;;  %118 = vmatpush1.msra.mxu0 %v46_v6  ;;  %v2607_v15 = vld [vmem:[#allocation4] sm:$0xff]  ;;  %v41_v16 = vld [vmem:[%s2981_s0 + $0x18] sm:$0xff]  ;;  %v43_v18 = vld [vmem:[%s2981_s0 + $0x28] sm:$0xff] }
  0x15   :  { %2111 = vmatprep.subr.mxu1 %v2489_v0  ;;  %1989 = vmatmul.mubr.msk.f32.vlgmr.msra.gmra.mxu0 %vm62_vm1, %v38_v7  ;;  %v42_v17 = vld [vmem:[%s2981_s0 + $0x20] sm:$0xff]  ;;  %v44_v19 = vld [vmem:[%s2981_s0 + $0x30] sm:$0xff]  ;;  %v45_v20 = vld [vmem:[%s2981_s0 + $0x38] sm:$0xff]  ;;  %s2491_s0 = smov 64  }
  0x16   :  { %2112 = vmatpush3.msra.mxu1 %v2570_v8  ;;  %157 = vmatprep.mubr.f32.mxu0 %v2489_v0  ;;  %v50_v24 = vld [vmem:[%s2985_s4] sm:$0x3]  ;;  %s2492_s4 = smov 32  }
  0x17   :  { %2113 = vmatprep.subr.mxu1 %v2489_v0  ;;  %2151 = vmatprep.subr.mxu0 %v2489_v0  ;;  %v55_v26 = vrot.slane %v50_v24, %v54_v23  ;;  %v59_v27 = vrot.slane %v50_v24, %v58_v25 }
  0x18   :  { %2114 = vmatpush3.msra.mxu1 %v2577_v9  ;;  %2152 = vmatpush3.msra.mxu0 %v2546_v2 }
  0x19   :  { %2116 = vmatmul.mubr.f32.vlgmr.msra.gmra.mxu1 %v2489_v0  ;;  %2118 = vmatprep.subr.mxu1 %v2489_v0 }
  0x1a   :  { %1990 = vmatmul.mubr.msk.f32.gmra.mxu0 %vm62_vm1, %v39_v10  ;;  %2119 = vmatpush3.msra.mxu1 %v2586_v11 }
  0x1b   :  { %163 = vmatprep.mubr.f32.mxu0 %v2489_v0  ;;  %2120 = vmatprep.subr.mxu1 %v2489_v0 }
  0x1c   :  { %2121 = vmatpush3.msra.mxu1 %v2592_v12  ;;  %2126 = vmatprep.mubr.msk.f32.mxu1 %vm2490_vm0, %v2489_v0 }
  0x1d   :  { %2122 = vmatprep.subr.mxu1 %v2489_v0  ;;  %2153 = vmatprep.subr.mxu0 %v2489_v0 }
  0x1e   :  { %1991 = vmatmul.mubr.msk.f32.gmra.mxu0 %vm62_vm1, %v40_v13  ;;  %2123 = vmatpush3.msra.mxu1 %v2601_v14 }
  0x1f   :  { %169 = vmatprep.mubr.f32.mxu0 %v2489_v0  ;;  %2124 = vmatprep.subr.mxu1 %v2489_v0 }
  0x20   :  { %2125 = vmatpush3.msra.mxu1 %v2607_v15  ;;  %2154 = vmatpush3.msra.mxu0 %v2558_v5 }
  0x21   :  { %2127 = vmatmul.mubr.f32.vlgmr.msra.gmra.mxu1 %v2489_v0  ;;  %2129 = vmatprep.subr.mxu1 %v2489_v0 }
  0x22   :  { %1992 = vmatmul.mubr.msk.f32.gmra.mxu0 %vm62_vm1, %v41_v16  ;;  %2130 = vmatpush3.msra.mxu1 %v2546_v2 }
  0x23   :  { %175 = vmatprep.mubr.f32.mxu0 %v2489_v0  ;;  %2131 = vmatprep.subr.mxu1 %v2489_v0 }
  0x24   :  { %2132 = vmatpush3.msra.mxu1 %v2558_v5  ;;  %2137 = vmatprep.mubr.msk.f32.mxu1 %vm2490_vm0, %v2489_v0 }
  0x25   :  { %2133 = vmatprep.subr.mxu1 %v2489_v0  ;;  %2155 = vmatprep.subr.mxu0 %v2489_v0 }
  0x26   :  { %1993 = vmatmul.mubr.msk.f32.gmra.mxu0 %vm62_vm1, %v42_v17  ;;  %2134 = vmatpush3.msra.mxu1 %v2570_v8 }
  0x27   :  { %181 = vmatprep.mubr.f32.mxu0 %v2489_v0  ;;  %2135 = vmatprep.subr.mxu1 %v2489_v0 }
  0x28   :  { %2136 = vmatpush3.msra.mxu1 %v2577_v9  ;;  %2156 = vmatpush3.msra.mxu0 %v2570_v8 }
  0x29   :  { %2140 = vmatprep.subr.mxu1 %v2489_v0  ;;  %2157 = vmatprep.subr.mxu0 %v2489_v0 }
  0x2a   :  { %1994 = vmatmul.mubr.msk.f32.gmra.mxu0 %vm62_vm1, %v43_v18 }
  0x2b   :  { %187 = vmatprep.mubr.f32.mxu0 %v2489_v0  ;;  %2158 = vmatpush3.msra.mxu0 %v2577_v9 }
  0x2c   :  { %2173 = vmatprep.subr.mxu0 %v2489_v0 }
  0x2e   :  { %1995 = vmatmul.mubr.msk.f32.gmra.mxu0 %vm62_vm1, %v44_v19 }
  0x2f   :  { %193 = vmatprep.mubr.f32.mxu0 %v2489_v0 }
  0x32   :  { %1996 = vmatmul.mubr.msk.f32.gmra.mxu0 %vm62_vm1, %v45_v20 }
  0x33   :  { %2159 = vmatprep.mubr.msk.f32.mxu0 %vm2490_vm0, %v2489_v0 }
  0xd5   :  { %v153_v28 = vpop.f32.mrf.mxu0 }
  0xd6   :  { %v154_v29 = vadd.f32 %v153_v28, %v55_v26 }
  0xd7   :  { %v155_v30 = vpop.f32.mrf.mxu0 }
  0xd8   :  { %v2663_v31 = vadd.f32 %v155_v30, %v59_v27 }
  0xd9   :  { %v291_v32 = vpop.f32.mrf.mxu1 }
  0xda   :  { %v295_v33 = vadd.f32 %v291_v32, %v154_v29  ;;  %v159_v34 = vpop.f32.mrf.mxu0 }
  0xdb   :  { %v2665_v35 = vadd.f32 %v159_v34, %v55_v26  ;;  %v2117_v36 = vpop.f32.mrf.mxu1 }
  0xdc   :  { %2292 = vtanh.f32 %v295_v33  ;;  %v161_v37 = vpop.f32.mrf.mxu0  ;;  %v1997_v7 = vmul.f32 -1.442695, %v295_v33 }
  0xdd   :  { %v2667_v38 = vadd.f32 %v161_v37, %v59_v27 }
  0xde   :  { %v165_v39 = vpop.f32.mrf.mxu0 }
  0xdf   :  { %v2669_v40 = vadd.f32 %v165_v39, %v55_v26 }
  0xe0   :  { %v167_v41 = vpop.f32.mrf.mxu0 }
  0xe1   :  { %v2671_v42 = vadd.f32 %v167_v41, %v59_v27  ;;  %v368_v43 = vpop.f32.mrf.mxu1 }
  0xe2   :  { %v171_v44 = vpop.f32.mrf.mxu0 }
  0xe3   :  { %v2673_v45 = vadd.f32 %v171_v44, %v55_v26  ;;  %v2128_v46 = vpop.f32.mrf.mxu1 }
  0xe4   :  { %v173_v47 = vpop.f32.mrf.mxu0 }
  0xe5   :  { %v2675_v48 = vadd.f32 %v173_v47, %v59_v27 }
  0xe6   :  { %v177_v49 = vpop.f32.mrf.mxu0 }
  0xe7   :  { %v2677_v50 = vadd.f32 %v177_v49, %v55_v26 }
  0xe8   :  { %v179_v51 = vpop.f32.mrf.mxu0 }
  0xe9   :  { %v2293_v52 = vpop.eup %2292  ;;  %v2679_v53 = vadd.f32 %v179_v51, %v59_v27 }
  0xea   :  { %v183_v54 = vpop.f32.mrf.mxu0  ;;  %382 = vrot.lane.b32.xlu0 %v2293_v52, %s2491_s0 }
  0xeb   :  { %v2682_v55 = vadd.f32 %v183_v54, %v55_v26 }
  0xec   :  { %v185_v56 = vpop.f32.mrf.mxu0 }
  0xed   :  { %v2684_v57 = vadd.f32 %v185_v56, %v59_v27 }
  0xee   :  { %v189_v58 = vpop.f32.mrf.mxu0 }
  0xef   :  { %v2686_v59 = vadd.f32 %v189_v58, %v55_v26 }
  0xf0   :  { %v191_v60 = vpop.f32.mrf.mxu0 }
  0xf1   :  { %v2688_v61 = vadd.f32 %v191_v60, %v59_v27 }
  0xf2   :  { %v195_v62 = vpop.f32.mrf.mxu0 }
  0xf3   :  { %v2690_v63 = vadd.f32 %v195_v62, %v55_v26 }
  0xf4   :  { %v197_v1 = vpop.f32.mrf.mxu0 }
  0xf5   :  { %v198_v3 = vadd.f32 %v197_v1, %v59_v27 }
  0xf7   :  { %v372_v4 = vadd.f32 %v368_v43, %v198_v3 }
  0xf9   :  { %2294 = vtanh.f32 %v372_v4  ;;  %v1998_v16 = vmul.f32 -1.442695, %v372_v4 }
  0xfa   :  { %2296 = vpow2.f32 %v1997_v7 }
 0x106   :  { %v2295_v6 = vpop.eup %2294 }
 0x107   :  { %406 = vrot.lane.b32.xlu0 %v2295_v6, %s2491_s0  ;;  %v2297_v10 = vpop.eup %2296 }
 0x108   :  { %v376_v13 = vadd.f32 1.0, %v2297_v10 }
 0x10a   :  { %2298 = vrcp.f32 %v376_v13 }
 0x10b   :  { %2300 = vpow2.f32 %v1998_v16 }
 0x117   :  { %v2299_v17 = vpop.eup %2298 }
 0x118   :  { %v2301_v20 = vpop.eup %2300  ;;  %v380_v25 = vmul.f32 0.0, %v2299_v17 }
 0x119   :  { %v400_v21 = vadd.f32 1.0, %v2301_v20 }
 0x11b   :  { %2302 = vrcp.f32 %v400_v21 }
 0x128   :  { %v2303_v22 = vpop.eup %2302 }
 0x129   :  { %v404_v29 = vmul.f32 0.0, %v2303_v22 }
 0x15c   :  { %v383_v18 = vpop.permute.xlu0 %382 }
 0x15d   :  { %v385_v19 = vmul.f32 %v2299_v17, %v383_v18 }
 0x15f   :  { %387 = vrot.lane.b32.xlu1 %v385_v19, %s2492_s4 }
 0x179   :  { %v407_v23 = vpop.permute.xlu0 %406 }
 0x17a   :  { %v409_v24 = vmul.f32 %v2303_v22, %v407_v23 }
 0x17c   :  { %411 = vrot.lane.b32.xlu1 %v409_v24, %s2492_s4 }
 0x1d1   :  { %v388_v26 = vpop.permute.xlu1 %387 }
 0x1d2   :  { %v2695_v27 = vadd.f32 %v388_v26, %v380_v25 }
 0x1d4   :  { %2304 = vtanh.f32 %v2695_v27 }
 0x1e1   :  { %v2305_v28 = vpop.eup %2304 }
 0x1e2   :  { %393 = vrot.lane.b32.xlu0 %v2305_v28, %s2491_s0 }
 0x1ee   :  { %v412_v30 = vpop.permute.xlu1 %411 }
 0x1ef   :  { %v2699_v32 = vadd.f32 %v412_v30, %v404_v29 }
 0x1f1   :  { %2306 = vtanh.f32 %v2699_v32 }
 0x1fe   :  { %v2307_v33 = vpop.eup %2306 }
 0x1ff   :  { %417 = vrot.lane.b32.xlu1 %v2307_v33, %s2491_s0 }
 0x254   :  { %v394_v34 = vpop.permute.xlu0 %393 }
 0x255   :  { %v396_v36 = vmul.f32 %v2299_v17, %v394_v34 }
 0x257   :  { %422 = vrot.lane.b32.xlu0 %v396_v36, %s2492_s4 }
 0x271   :  { %v418_v37 = vpop.permute.xlu1 %417 }
 0x272   :  { %v420_v39 = vmul.f32 %v2303_v22, %v418_v37 }
 0x274   :  { %427 = vrot.lane.b32.xlu1 %v420_v39, %s2492_s4 }
 0x2c9   :  { %v423_v41 = vpop.permute.xlu0 %422 }
 0x2ca   :  { %425 = vst.msk [vmem:[#allocation7] sm:$0xff] %vm221_vm2, %v423_v41  ;;  %2138 = vmatmul.mubr.msk.f32.vlgmr.msra.gmra.mxu1 %vm221_vm2, %v423_v41 }
 0x2cb   :  { %2141 = vmatpush3.msra.mxu1 %v2586_v11  ;;  %2148 = vmatprep.mubr.msk.f32.mxu1 %vm2490_vm0, %v2489_v0 }
 0x2cc   :  { %2142 = vmatprep.subr.mxu1 %v2489_v0 }
 0x2cd   :  { %2143 = vmatpush3.msra.mxu1 %v2592_v12 }
 0x2ce   :  { %2144 = vmatprep.subr.mxu1 %v2489_v0 }
 0x2cf   :  { %2145 = vmatpush3.msra.mxu1 %v2601_v14 }
 0x2d0   :  { %2146 = vmatprep.subr.mxu1 %v2489_v0 }
 0x2d1   :  { %2147 = vmatpush3.msra.mxu1 %v2607_v15 }
 0x2d2   :  { %2162 = vmatprep.subr.mxu1 %v2489_v0 }
 0x2e6   :  { %v428_v43 = vpop.permute.xlu1 %427 }
 0x2e7   :  { %431 = vst.msk [vmem:[#allocation8 + $0x38] sm:$0xff] %vm221_vm2, %v428_v43  ;;  %2149 = vmatmul.mubr.msk.f32.vlgmr.msra.gmra.mxu1 %vm221_vm2, %v428_v43 }
 0x2e8   :  { %2163 = vmatpush3.msra.mxu1 %v2586_v11  ;;  %2170 = vmatprep.mubr.msk.f32.mxu1 %vm2490_vm0, %v2489_v0 }
 0x2e9   :  { %2164 = vmatprep.subr.mxu1 %v2489_v0 }
 0x2ea   :  { %2165 = vmatpush3.msra.mxu1 %v2592_v12 }
 0x2eb   :  { %2166 = vmatprep.subr.mxu1 %v2489_v0 }
 0x2ec   :  { %2167 = vmatpush3.msra.mxu1 %v2601_v14 }
 0x2ed   :  { %2168 = vmatprep.subr.mxu1 %v2489_v0 }
 0x2ee   :  { %2169 = vmatpush3.msra.mxu1 %v2607_v15 }
 0x2ef   :  { %2184 = vmatprep.subr.mxu1 %v2489_v0 }
 0x38a   :  { %v506_v44 = vpop.f32.mrf.mxu1 }
 0x38b   :  { %v510_v46 = vadd.f32 %v506_v44, %v2665_v35 }
 0x38c   :  { %v2139_v47 = vpop.f32.mrf.mxu1 }
 0x38d   :  { %2308 = vtanh.f32 %v510_v46  ;;  %v2001_v58 = vmul.f32 -1.442695, %v510_v46 }
 0x39a   :  { %v2309_v49 = vpop.eup %2308 }
 0x39b   :  { %599 = vrot.lane.b32.xlu0 %v2309_v49, %s2491_s0 }
 0x3a7   :  { %v585_v51 = vpop.f32.mrf.mxu1 }
 0x3a8   :  { %v589_v52 = vadd.f32 %v585_v51, %v2688_v61 }
 0x3a9   :  { %v2150_v54 = vpop.f32.mrf.mxu1 }
 0x3aa   :  { %2310 = vtanh.f32 %v589_v52  ;;  %v2002_v1 = vmul.f32 -1.442695, %v589_v52 }
 0x3ab   :  { %2312 = vpow2.f32 %v2001_v58 }
 0x3b7   :  { %v2311_v56 = vpop.eup %2310 }
 0x3b8   :  { %623 = vrot.lane.b32.xlu1 %v2311_v56, %s2491_s0  ;;  %v2313_v60 = vpop.eup %2312 }
 0x3b9   :  { %v593_v62 = vadd.f32 1.0, %v2313_v60 }
 0x3bb   :  { %2314 = vrcp.f32 %v593_v62 }
 0x3bc   :  { %2316 = vpow2.f32 %v2002_v1 }
 0x3c8   :  { %v2315_v35 = vpop.eup %2314 }
 0x3c9   :  { %v2317_v6 = vpop.eup %2316  ;;  %v597_v16 = vmul.f32 %v2315_v35, %v2695_v27 }
 0x3ca   :  { %v617_v7 = vadd.f32 1.0, %v2317_v6 }
 0x3cc   :  { %2318 = vrcp.f32 %v617_v7 }
 0x3d9   :  { %v2319_v61 = vpop.eup %2318 }
 0x3da   :  { %v621_v20 = vmul.f32 %v2319_v61, %v2699_v32 }
 0x40d   :  { %v600_v3 = vpop.permute.xlu0 %599 }
 0x40e   :  { %v602_v4 = vmul.f32 %v2315_v35, %v600_v3 }
 0x410   :  { %604 = vrot.lane.b32.xlu0 %v602_v4, %s2492_s4 }
 0x42a   :  { %v624_v10 = vpop.permute.xlu1 %623 }
 0x42b   :  { %v626_v13 = vmul.f32 %v2319_v61, %v624_v10 }
 0x42d   :  { %628 = vrot.lane.b32.xlu1 %v626_v13, %s2492_s4 }
 0x482   :  { %v605_v17 = vpop.permute.xlu0 %604 }
 0x483   :  { %v2736_v18 = vadd.f32 %v605_v17, %v597_v16 }
 0x485   :  { %2320 = vtanh.f32 %v2736_v18 }
 0x492   :  { %v2321_v19 = vpop.eup %2320 }
 0x493   :  { %610 = vrot.lane.b32.xlu0 %v2321_v19, %s2491_s0 }
 0x49f   :  { %v629_v21 = vpop.permute.xlu1 %628 }
 0x4a0   :  { %v2741_v22 = vadd.f32 %v629_v21, %v621_v20 }
 0x4a2   :  { %2322 = vtanh.f32 %v2741_v22 }
 0x4af   :  { %v2323_v23 = vpop.eup %2322 }
 0x4b0   :  { %634 = vrot.lane.b32.xlu1 %v2323_v23, %s2491_s0 }
 0x505   :  { %v611_v24 = vpop.permute.xlu0 %610 }
 0x506   :  { %v613_v25 = vmul.f32 %v2315_v35, %v611_v24 }
 0x508   :  { %639 = vrot.lane.b32.xlu0 %v613_v25, %s2492_s4 }
 0x522   :  { %v635_v26 = vpop.permute.xlu1 %634 }
 0x523   :  { %v637_v27 = vmul.f32 %v2319_v61, %v635_v26 }
 0x525   :  { %645 = vrot.lane.b32.xlu1 %v637_v27, %s2492_s4 }
 0x57a   :  { %v640_v28 = vpop.permute.xlu0 %639 }
 0x57b   :  { %643 = vst.msk [vmem:[#allocation7 + $0x8] sm:$0xff] %vm221_vm2, %v640_v28  ;;  %2160 = vmatmul.mubr.msk.f32.vlgmr.msra.gmra.mxu0 %vm221_vm2, %v640_v28 }
 0x57c   :  { %2174 = vmatpush3.msra.mxu0 %v2546_v2  ;;  %2181 = vmatprep.mubr.msk.f32.mxu0 %vm2490_vm0, %v2489_v0 }
 0x57d   :  { %2175 = vmatprep.subr.mxu0 %v2489_v0 }
 0x57e   :  { %2176 = vmatpush3.msra.mxu0 %v2558_v5 }
 0x57f   :  { %2177 = vmatprep.subr.mxu0 %v2489_v0 }
 0x580   :  { %2178 = vmatpush3.msra.mxu0 %v2570_v8 }
 0x581   :  { %2179 = vmatprep.subr.mxu0 %v2489_v0 }
 0x582   :  { %2180 = vmatpush3.msra.mxu0 %v2577_v9 }
 0x583   :  { %2195 = vmatprep.subr.mxu0 %v2489_v0 }
 0x597   :  { %v646_v29 = vpop.permute.xlu1 %645 }
 0x598   :  { %649 = vst.msk [vmem:[#allocation8 + $0x30] sm:$0xff] %vm221_vm2, %v646_v29  ;;  %2171 = vmatmul.mubr.msk.f32.vlgmr.msra.gmra.mxu1 %vm221_vm2, %v646_v29 }
 0x599   :  { %2185 = vmatpush3.msra.mxu1 %v2586_v11  ;;  %2192 = vmatprep.mubr.msk.f32.mxu1 %vm2490_vm0, %v2489_v0 }
 0x59a   :  { %2186 = vmatprep.subr.mxu1 %v2489_v0 }
 0x59b   :  { %2187 = vmatpush3.msra.mxu1 %v2592_v12 }
 0x59c   :  { %2188 = vmatprep.subr.mxu1 %v2489_v0 }
 0x59d   :  { %2189 = vmatpush3.msra.mxu1 %v2601_v14 }
 0x59e   :  { %2190 = vmatprep.subr.mxu1 %v2489_v0 }
 0x59f   :  { %2191 = vmatpush3.msra.mxu1 %v2607_v15 }
 0x5a0   :  { %2206 = vmatprep.subr.mxu1 %v2489_v0 }
 0x63b   :  { %v724_v30 = vpop.f32.mrf.mxu0 }
 0x63c   :  { %v728_v32 = vadd.f32 %v724_v30, %v2669_v40 }
 0x63d   :  { %v2161_v33 = vpop.f32.mrf.mxu0 }
 0x63e   :  { %2324 = vtanh.f32 %v728_v32  ;;  %v2005_v43 = vmul.f32 -1.442695, %v728_v32 }
 0x64b   :  { %v2325_v34 = vpop.eup %2324 }
 0x64c   :  { %817 = vrot.lane.b32.xlu0 %v2325_v34, %s2491_s0 }
 0x658   :  { %v803_v36 = vpop.f32.mrf.mxu1 }
 0x659   :  { %v807_v37 = vadd.f32 %v803_v36, %v2684_v57 }
 0x65a   :  { %v2172_v39 = vpop.f32.mrf.mxu1 }
 0x65b   :  { %2326 = vtanh.f32 %v807_v37  ;;  %v2006_v47 = vmul.f32 -1.442695, %v807_v37 }
 0x65c   :  { %2328 = vpow2.f32 %v2005_v43 }
 0x668   :  { %v2327_v41 = vpop.eup %2326 }
 0x669   :  { %841 = vrot.lane.b32.xlu1 %v2327_v41, %s2491_s0  ;;  %v2329_v44 = vpop.eup %2328 }
 0x66a   :  { %v811_v46 = vadd.f32 1.0, %v2329_v44 }
 0x66c   :  { %2330 = vrcp.f32 %v811_v46 }
 0x66d   :  { %2332 = vpow2.f32 %v2006_v47 }
 0x679   :  { %v2331_v40 = vpop.eup %2330 }
 0x67a   :  { %v2333_v52 = vpop.eup %2332  ;;  %v815_v60 = vmul.f32 %v2331_v40, %v2736_v18 }
 0x67b   :  { %v835_v54 = vadd.f32 1.0, %v2333_v52 }
 0x67d   :  { %2334 = vrcp.f32 %v835_v54 }
 0x68a   :  { %v2335_v57 = vpop.eup %2334 }
 0x68b   :  { %v839_v3 = vmul.f32 %v2335_v57, %v2741_v22 }
 0x6be   :  { %v818_v49 = vpop.permute.xlu0 %817 }
 0x6bf   :  { %v820_v51 = vmul.f32 %v2331_v40, %v818_v49 }
 0x6c1   :  { %822 = vrot.lane.b32.xlu0 %v820_v51, %s2492_s4 }
 0x6db   :  { %v842_v56 = vpop.permute.xlu1 %841 }
 0x6dc   :  { %v844_v58 = vmul.f32 %v2335_v57, %v842_v56 }
 0x6de   :  { %846 = vrot.lane.b32.xlu1 %v844_v58, %s2492_s4 }
 0x733   :  { %v823_v62 = vpop.permute.xlu0 %822 }
 0x734   :  { %v2778_v1 = vadd.f32 %v823_v62, %v815_v60 }
 0x736   :  { %2336 = vtanh.f32 %v2778_v1 }
 0x743   :  { %v2337_v35 = vpop.eup %2336 }
 0x744   :  { %828 = vrot.lane.b32.xlu0 %v2337_v35, %s2491_s0 }
 0x750   :  { %v847_v4 = vpop.permute.xlu1 %846 }
 0x751   :  { %v2783_v6 = vadd.f32 %v847_v4, %v839_v3 }
 0x753   :  { %2338 = vtanh.f32 %v2783_v6 }
 0x760   :  { %v2339_v7 = vpop.eup %2338 }
 0x761   :  { %852 = vrot.lane.b32.xlu1 %v2339_v7, %s2491_s0 }
 0x7b6   :  { %v829_v61 = vpop.permute.xlu0 %828 }
 0x7b7   :  { %v831_v10 = vmul.f32 %v2331_v40, %v829_v61 }
 0x7b9   :  { %857 = vrot.lane.b32.xlu0 %v831_v10, %s2492_s4 }
 0x7d3   :  { %v853_v13 = vpop.permute.xlu1 %852 }
 0x7d4   :  { %v855_v16 = vmul.f32 %v2335_v57, %v853_v13 }
 0x7d6   :  { %863 = vrot.lane.b32.xlu1 %v855_v16, %s2492_s4 }
 0x82b   :  { %v858_v17 = vpop.permute.xlu0 %857 }
 0x82c   :  { %861 = vst.msk [vmem:[#allocation7 + $0x10] sm:$0xff] %vm221_vm2, %v858_v17  ;;  %2182 = vmatmul.mubr.msk.f32.vlgmr.msra.gmra.mxu0 %vm221_vm2, %v858_v17 }
 0x82d   :  { %2196 = vmatpush3.msra.mxu0 %v2546_v2  ;;  %2203 = vmatprep.mubr.msk.f32.mxu0 %vm2490_vm0, %v2489_v0 }
 0x82e   :  { %2197 = vmatprep.subr.mxu0 %v2489_v0 }
 0x82f   :  { %2198 = vmatpush3.msra.mxu0 %v2558_v5 }
 0x830   :  { %2199 = vmatprep.subr.mxu0 %v2489_v0 }
 0x831   :  { %2200 = vmatpush3.msra.mxu0 %v2570_v8 }
 0x832   :  { %2201 = vmatprep.subr.mxu0 %v2489_v0 }
 0x833   :  { %2202 = vmatpush3.msra.mxu0 %v2577_v9 }
 0x834   :  { %2217 = vmatprep.subr.mxu0 %v2489_v0 }
 0x848   :  { %v864_v18 = vpop.permute.xlu1 %863 }
 0x849   :  { %867 = vst.msk [vmem:[#allocation8 + $0x28] sm:$0xff] %vm221_vm2, %v864_v18  ;;  %2193 = vmatmul.mubr.msk.f32.vlgmr.msra.gmra.mxu1 %vm221_vm2, %v864_v18 }
 0x84a   :  { %2207 = vmatpush3.msra.mxu1 %v2586_v11  ;;  %2214 = vmatprep.mubr.msk.f32.mxu1 %vm2490_vm0, %v2489_v0 }
 0x84b   :  { %2208 = vmatprep.subr.mxu1 %v2489_v0 }
 0x84c   :  { %2209 = vmatpush3.msra.mxu1 %v2592_v12 }
 0x84d   :  { %2210 = vmatprep.subr.mxu1 %v2489_v0 }
 0x84e   :  { %2211 = vmatpush3.msra.mxu1 %v2601_v14 }
 0x84f   :  { %2212 = vmatprep.subr.mxu1 %v2489_v0 }
 0x850   :  { %2213 = vmatpush3.msra.mxu1 %v2607_v15 }
 0x851   :  { %2228 = vmatprep.subr.mxu1 %v2489_v0 }
 0x8ec   :  { %v942_v19 = vpop.f32.mrf.mxu0 }
 0x8ed   :  { %v946_v20 = vadd.f32 %v942_v19, %v2673_v45 }
 0x8ee   :  { %v2183_v21 = vpop.f32.mrf.mxu0 }
 0x8ef   :  { %2340 = vtanh.f32 %v946_v20  ;;  %v2009_v27 = vmul.f32 -1.442695, %v946_v20 }
 0x8fc   :  { %v2341_v22 = vpop.eup %2340 }
 0x8fd   :  { %1035 = vrot.lane.b32.xlu0 %v2341_v22, %s2491_s0 }
 0x909   :  { %v1021_v23 = vpop.f32.mrf.mxu1 }
 0x90a   :  { %v1025_v24 = vadd.f32 %v1021_v23, %v2679_v53 }
 0x90b   :  { %v2194_v25 = vpop.f32.mrf.mxu1 }
 0x90c   :  { %2342 = vtanh.f32 %v1025_v24  ;;  %v2010_v30 = vmul.f32 -1.442695, %v1025_v24 }
 0x90d   :  { %2344 = vpow2.f32 %v2009_v27 }
 0x919   :  { %v2343_v26 = vpop.eup %2342 }
 0x91a   :  { %1059 = vrot.lane.b32.xlu1 %v2343_v26, %s2491_s0  ;;  %v2345_v28 = vpop.eup %2344 }
 0x91b   :  { %v1029_v29 = vadd.f32 1.0, %v2345_v28 }
 0x91d   :  { %2346 = vrcp.f32 %v1029_v29 }
 0x91e   :  { %2348 = vpow2.f32 %v2010_v30 }
 0x92a   :  { %v2347_v45 = vpop.eup %2346 }
 0x92b   :  { %v2349_v34 = vpop.eup %2348  ;;  %v1033_v41 = vmul.f32 %v2347_v45, %v2778_v1 }
 0x92c   :  { %v1053_v36 = vadd.f32 1.0, %v2349_v34 }
 0x92e   :  { %2350 = vrcp.f32 %v1053_v36 }
 0x93b   :  { %v2351_v53 = vpop.eup %2350 }
 0x93c   :  { %v1057_v47 = vmul.f32 %v2351_v53, %v2783_v6 }
 0x96f   :  { %v1036_v32 = vpop.permute.xlu0 %1035 }
 0x970   :  { %v1038_v33 = vmul.f32 %v2347_v45, %v1036_v32 }
 0x972   :  { %1040 = vrot.lane.b32.xlu0 %v1038_v33, %s2492_s4 }
 0x98c   :  { %v1060_v37 = vpop.permute.xlu1 %1059 }
 0x98d   :  { %v1062_v39 = vmul.f32 %v2351_v53, %v1060_v37 }
 0x98f   :  { %1064 = vrot.lane.b32.xlu1 %v1062_v39, %s2492_s4 }
 0x9e4   :  { %v1041_v43 = vpop.permute.xlu0 %1040 }
 0x9e5   :  { %v2820_v44 = vadd.f32 %v1041_v43, %v1033_v41 }
 0x9e7   :  { %2352 = vtanh.f32 %v2820_v44 }
 0x9f4   :  { %v2353_v46 = vpop.eup %2352 }
 0x9f5   :  { %1046 = vrot.lane.b32.xlu0 %v2353_v46, %s2491_s0 }
 0xa01   :  { %v1065_v40 = vpop.permute.xlu1 %1064 }
 0xa02   :  { %v2825_v49 = vadd.f32 %v1065_v40, %v1057_v47 }
 0xa04   :  { %2354 = vtanh.f32 %v2825_v49 }
 0xa11   :  { %v2355_v51 = vpop.eup %2354 }
 0xa12   :  { %1070 = vrot.lane.b32.xlu1 %v2355_v51, %s2491_s0 }
 0xa67   :  { %v1047_v52 = vpop.permute.xlu0 %1046 }
 0xa68   :  { %v1049_v54 = vmul.f32 %v2347_v45, %v1047_v52 }
 0xa6a   :  { %1075 = vrot.lane.b32.xlu0 %v1049_v54, %s2492_s4 }
 0xa84   :  { %v1071_v57 = vpop.permute.xlu1 %1070 }
 0xa85   :  { %v1073_v56 = vmul.f32 %v2351_v53, %v1071_v57 }
 0xa87   :  { %1081 = vrot.lane.b32.xlu1 %v1073_v56, %s2492_s4 }
 0xadc   :  { %v1076_v58 = vpop.permute.xlu0 %1075 }
 0xadd   :  { %1079 = vst.msk [vmem:[#allocation7 + $0x18] sm:$0xff] %vm221_vm2, %v1076_v58  ;;  %2204 = vmatmul.mubr.msk.f32.vlgmr.msra.gmra.mxu0 %vm221_vm2, %v1076_v58 }
 0xade   :  { %2218 = vmatpush3.msra.mxu0 %v2546_v2  ;;  %2225 = vmatprep.mubr.msk.f32.mxu0 %vm2490_vm0, %v2489_v0 }
 0xadf   :  { %2219 = vmatprep.subr.mxu0 %v2489_v0 }
 0xae0   :  { %2220 = vmatpush3.msra.mxu0 %v2558_v5 }
 0xae1   :  { %2221 = vmatprep.subr.mxu0 %v2489_v0 }
 0xae2   :  { %2222 = vmatpush3.msra.mxu0 %v2570_v8 }
 0xae3   :  { %2223 = vmatprep.subr.mxu0 %v2489_v0 }
 0xae4   :  { %2224 = vmatpush3.msra.mxu0 %v2577_v9 }
 0xae5   :  { %2239 = vmatprep.subr.mxu0 %v2489_v0 }
 0xaf9   :  { %v1082_v60 = vpop.permute.xlu1 %1081 }
 0xafa   :  { %1085 = vst.msk [vmem:[#allocation8 + $0x20] sm:$0xff] %vm221_vm2, %v1082_v60  ;;  %2215 = vmatmul.mubr.msk.f32.vlgmr.msra.gmra.mxu1 %vm221_vm2, %v1082_v60 }
 0xafb   :  { %2229 = vmatpush3.msra.mxu1 %v2586_v11  ;;  %2236 = vmatprep.mubr.msk.f32.mxu1 %vm2490_vm0, %v2489_v0 }
 0xafc   :  { %2230 = vmatprep.subr.mxu1 %v2489_v0 }
 0xafd   :  { %2231 = vmatpush3.msra.mxu1 %v2592_v12 }
 0xafe   :  { %2232 = vmatprep.subr.mxu1 %v2489_v0 }
 0xaff   :  { %2233 = vmatpush3.msra.mxu1 %v2601_v14 }
 0xb00   :  { %2234 = vmatprep.subr.mxu1 %v2489_v0 }
 0xb01   :  { %2235 = vmatpush3.msra.mxu1 %v2607_v15 }
 0xb02   :  { %2250 = vmatprep.subr.mxu1 %v2489_v0 }
 0xb9d   :  { %v1160_v62 = vpop.f32.mrf.mxu0 }
 0xb9e   :  { %v1164_v1 = vadd.f32 %v1160_v62, %v2677_v50 }
 0xb9f   :  { %v2205_v35 = vpop.f32.mrf.mxu0 }
 0xba0   :  { %2356 = vtanh.f32 %v1164_v1  ;;  %v2013_v10 = vmul.f32 -1.442695, %v1164_v1 }
 0xbad   :  { %v2357_v3 = vpop.eup %2356 }
 0xbae   :  { %1253 = vrot.lane.b32.xlu0 %v2357_v3, %s2491_s0 }
 0xbba   :  { %v1239_v4 = vpop.f32.mrf.mxu1 }
 0xbbb   :  { %v1243_v6 = vadd.f32 %v1239_v4, %v2675_v48 }
 0xbbc   :  { %v2216_v7 = vpop.f32.mrf.mxu1 }
 0xbbd   :  { %2358 = vtanh.f32 %v1243_v6  ;;  %v2014_v17 = vmul.f32 -1.442695, %v1243_v6 }
 0xbbe   :  { %2360 = vpow2.f32 %v2013_v10 }
 0xbca   :  { %v2359_v61 = vpop.eup %2358 }
 0xbcb   :  { %1277 = vrot.lane.b32.xlu1 %v2359_v61, %s2491_s0  ;;  %v2361_v13 = vpop.eup %2360 }
 0xbcc   :  { %v1247_v16 = vadd.f32 1.0, %v2361_v13 }
 0xbce   :  { %2362 = vrcp.f32 %v1247_v16 }
 0xbcf   :  { %2364 = vpow2.f32 %v2014_v17 }
 0xbdb   :  { %v2363_v50 = vpop.eup %2362 }
 0xbdc   :  { %v2365_v20 = vpop.eup %2364  ;;  %v1251_v24 = vmul.f32 %v2363_v50, %v2820_v44 }
 0xbdd   :  { %v1271_v21 = vadd.f32 1.0, %v2365_v20 }
 0xbdf   :  { %2366 = vrcp.f32 %v1271_v21 }
 0xbec   :  { %v2367_v48 = vpop.eup %2366 }
 0xbed   :  { %v1275_v28 = vmul.f32 %v2367_v48, %v2825_v49 }
 0xc20   :  { %v1254_v18 = vpop.permute.xlu0 %1253 }
 0xc21   :  { %v1256_v19 = vmul.f32 %v2363_v50, %v1254_v18 }
 0xc23   :  { %1258 = vrot.lane.b32.xlu0 %v1256_v19, %s2492_s4 }
 0xc3d   :  { %v1278_v22 = vpop.permute.xlu1 %1277 }
 0xc3e   :  { %v1280_v23 = vmul.f32 %v2367_v48, %v1278_v22 }
 0xc40   :  { %1282 = vrot.lane.b32.xlu1 %v1280_v23, %s2492_s4 }
 0xc95   :  { %v1259_v25 = vpop.permute.xlu0 %1258 }
 0xc96   :  { %v2862_v26 = vadd.f32 %v1259_v25, %v1251_v24 }
 0xc98   :  { %2368 = vtanh.f32 %v2862_v26 }
 0xca5   :  { %v2369_v27 = vpop.eup %2368 }
 0xca6   :  { %1264 = vrot.lane.b32.xlu0 %v2369_v27, %s2491_s0 }
 0xcb2   :  { %v1283_v29 = vpop.permute.xlu1 %1282 }
 0xcb3   :  { %v2867_v30 = vadd.f32 %v1283_v29, %v1275_v28 }
 0xcb5   :  { %2370 = vtanh.f32 %v2867_v30 }
 0xcc2   :  { %v2371_v45 = vpop.eup %2370 }
 0xcc3   :  { %1288 = vrot.lane.b32.xlu1 %v2371_v45, %s2491_s0 }
 0xd18   :  { %v1265_v32 = vpop.permute.xlu0 %1264 }
 0xd19   :  { %v1267_v33 = vmul.f32 %v2363_v50, %v1265_v32 }
 0xd1b   :  { %1293 = vrot.lane.b32.xlu0 %v1267_v33, %s2492_s4 }
 0xd35   :  { %v1289_v34 = vpop.permute.xlu1 %1288 }
 0xd36   :  { %v1291_v36 = vmul.f32 %v2367_v48, %v1289_v34 }
 0xd38   :  { %1299 = vrot.lane.b32.xlu1 %v1291_v36, %s2492_s4 }
 0xd8d   :  { %v1294_v53 = vpop.permute.xlu0 %1293 }
 0xd8e   :  { %1297 = vst.msk [vmem:[#allocation7 + $0x20] sm:$0xff] %vm221_vm2, %v1294_v53  ;;  %2226 = vmatmul.mubr.msk.f32.vlgmr.msra.gmra.mxu0 %vm221_vm2, %v1294_v53 }
 0xd8f   :  { %2240 = vmatpush3.msra.mxu0 %v2546_v2  ;;  %2247 = vmatprep.mubr.msk.f32.mxu0 %vm2490_vm0, %v2489_v0 }
 0xd90   :  { %2241 = vmatprep.subr.mxu0 %v2489_v0 }
 0xd91   :  { %2242 = vmatpush3.msra.mxu0 %v2558_v5 }
 0xd92   :  { %2243 = vmatprep.subr.mxu0 %v2489_v0 }
 0xd93   :  { %2244 = vmatpush3.msra.mxu0 %v2570_v8 }
 0xd94   :  { %2245 = vmatprep.subr.mxu0 %v2489_v0 }
 0xd95   :  { %2246 = vmatpush3.msra.mxu0 %v2577_v9 }
 0xd96   :  { %2261 = vmatprep.subr.mxu0 %v2489_v0 }
 0xdaa   :  { %v1300_v37 = vpop.permute.xlu1 %1299 }
 0xdab   :  { %1303 = vst.msk [vmem:[#allocation8 + $0x18] sm:$0xff] %vm221_vm2, %v1300_v37  ;;  %2237 = vmatmul.mubr.msk.f32.vlgmr.msra.gmra.mxu1 %vm221_vm2, %v1300_v37 }
 0xdac   :  { %2251 = vmatpush3.msra.mxu1 %v2586_v11  ;;  %2258 = vmatprep.mubr.msk.f32.mxu1 %vm2490_vm0, %v2489_v0 }
 0xdad   :  { %2252 = vmatprep.subr.mxu1 %v2489_v0 }
 0xdae   :  { %2253 = vmatpush3.msra.mxu1 %v2592_v12 }
 0xdaf   :  { %2254 = vmatprep.subr.mxu1 %v2489_v0 }
 0xdb0   :  { %2255 = vmatpush3.msra.mxu1 %v2601_v14 }
 0xdb1   :  { %2256 = vmatprep.subr.mxu1 %v2489_v0 }
 0xdb2   :  { %2257 = vmatpush3.msra.mxu1 %v2607_v15 }
 0xdb3   :  { %2272 = vmatprep.subr.mxu1 %v2489_v0 }
 0xe4e   :  { %v1378_v2 = vpop.f32.mrf.mxu0 }
 0xe4f   :  { %v1382_v5 = vadd.f32 %v1378_v2, %v2682_v55  ;;  %v1745_v2 = vld [vmem:[%s2983_s2 + $0x18] sm:$0xff] }
 0xe50   :  { %v2227_v8 = vpop.f32.mrf.mxu0 }
 0xe51   :  { %2372 = vtanh.f32 %v1382_v5  ;;  %v2017_v41 = vmul.f32 -1.442695, %v1382_v5  ;;  %v1744_v5 = vld [vmem:[%s2983_s2 + $0x10] sm:$0xff]  ;;  %v1743_v8 = vld [vmem:[%s2983_s2 + $0x8] sm:$0xff] }
 0xe5e   :  { %v2373_v9 = vpop.eup %2372 }
 0xe5f   :  { %1471 = vrot.lane.b32.xlu0 %v2373_v9, %s2491_s0  ;;  %v1742_v9 = vld [vmem:[%s2983_s2] sm:$0xff]  ;;  %s2493_s2 = smov [#allocation7]  }
 0xe60   :  { %s1961_s20 = sshll.u32 %s2493_s2, 4  ;;  %s1962_s20 = int_to_ptr.vmem [resolvable:$true] %s1961_s20 }
 0xe61   :  { %s2440_s21 = scalar_lea.vmem %s1962_s20, 1024  ;;  %p2445_p6 = scmp.lt.s32.totalorder %s1962_s20, %s1962_s20 }
 0xe62   :  { %p2441_p5 = scmp.ne.s32.totalorder %s1962_s20, %s2440_s21  ;;  %p2446_p7 = scmp.lt.s32.totalorder %s2440_s21, %s2440_s21 }
 0xe64   :  { %p2447_p8 = por %p2446_p7, %p2445_p6 }
 0xe66   :  { %p2448_p9 = pnand %p2447_p8, %p2441_p5 }
 0xe6b   :  { %v1457_v11 = vpop.f32.mrf.mxu1 }
 0xe6c   :  { %v1461_v12 = vadd.f32 %v1457_v11, %v2671_v42 }
 0xe6d   :  { %v2238_v39 = vpop.f32.mrf.mxu1 }
 0xe6e   :  { %2374 = vtanh.f32 %v1461_v12  ;;  %v2018_v44 = vmul.f32 -1.442695, %v1461_v12  ;;  %v1823_v12 = vld [vmem:[#allocation4 + $0x18] sm:$0xff]  ;;  %v1822_v39 = vld [vmem:[#allocation4 + $0x10] sm:$0xff] }
 0xe6f   :  { %2376 = vpow2.f32 %v2017_v41  ;;  %v1820_v41 = vld [vmem:[#allocation4] sm:$0xff] }
 0xe7b   :  { %v2375_v14 = vpop.eup %2374 }
 0xe7c   :  { %1495 = vrot.lane.b32.xlu1 %v2375_v14, %s2491_s0  ;;  %v2377_v15 = vpop.eup %2376  ;;  %v1821_v14 = vld [vmem:[#allocation4 + $0x8] sm:$0xff] }
 0xe7d   :  { %v1465_v43 = vadd.f32 1.0, %v2377_v15 }
 0xe7f   :  { %2378 = vrcp.f32 %v1465_v43 }
 0xe80   :  { %2380 = vpow2.f32 %v2018_v44 }
 0xe8c   :  { %v2379_v55 = vpop.eup %2378 }
 0xe8d   :  { %v2381_v40 = vpop.eup %2380  ;;  %v1469_v54 = vmul.f32 %v2379_v55, %v2862_v26 }
 0xe8e   :  { %v1489_v49 = vadd.f32 1.0, %v2381_v40 }
 0xe90   :  { %2382 = vrcp.f32 %v1489_v49 }
 0xe9d   :  { %v2383_v42 = vpop.eup %2382 }
 0xe9e   :  { %v1493_v60 = vmul.f32 %v2383_v42, %v2867_v30 }
 0xed1   :  { %v1472_v46 = vpop.permute.xlu0 %1471 }
 0xed2   :  { %v1474_v47 = vmul.f32 %v2379_v55, %v1472_v46 }
 0xed4   :  { %1476 = vrot.lane.b32.xlu0 %v1474_v47, %s2492_s4 }
 0xeee   :  { %v1496_v51 = vpop.permute.xlu1 %1495 }
 0xeef   :  { %v1498_v52 = vmul.f32 %v2383_v42, %v1496_v51 }
 0xef1   :  { %1500 = vrot.lane.b32.xlu1 %v1498_v52, %s2492_s4 }
 0xf46   :  { %v1477_v57 = vpop.permute.xlu0 %1476 }
 0xf47   :  { %v1479_v56 = vadd.f32 %v1477_v57, %v1469_v54 }
 0xf49   :  { %2384 = vtanh.f32 %v1479_v56 }
 0xf56   :  { %v2385_v58 = vpop.eup %2384 }
 0xf57   :  { %1482 = vrot.lane.b32.xlu0 %v2385_v58, %s2491_s0 }
 0xf63   :  { %v1501_v62 = vpop.permute.xlu1 %1500 }
 0xf64   :  { %v1503_v1 = vadd.f32 %v1501_v62, %v1493_v60 }
 0xf66   :  { %2386 = vtanh.f32 %v1503_v1 }
 0xf73   :  { %v2387_v35 = vpop.eup %2386 }
 0xf74   :  { %1506 = vrot.lane.b32.xlu1 %v2387_v35, %s2491_s0 }
 0xfc9   :  { %v1483_v3 = vpop.permute.xlu0 %1482 }
 0xfca   :  { %v1485_v4 = vmul.f32 %v2379_v55, %v1483_v3 }
 0xfcc   :  { %1511 = vrot.lane.b32.xlu0 %v1485_v4, %s2492_s4 }
 0xfe6   :  { %v1507_v6 = vpop.permute.xlu1 %1506 }
 0xfe7   :  { %v1509_v7 = vmul.f32 %v2383_v42, %v1507_v6 }
 0xfe9   :  { %1517 = vrot.lane.b32.xlu1 %v1509_v7, %s2492_s4 }
0x103e   :  { %v1512_v61 = vpop.permute.xlu0 %1511 }
0x103f   :  { %1515 = vst.msk [vmem:[#allocation7 + $0x28] sm:$0xff] %vm221_vm2, %v1512_v61  ;;  %2248 = vmatmul.mubr.msk.f32.vlgmr.msra.gmra.mxu0 %vm221_vm2, %v1512_v61 }
0x1040   :  { %2269 = vmatprep.mubr.msk.f32.mxu0 %vm2490_vm0, %v2489_v0  ;;  %2262 = vmatpush3.msra.mxu0 %v1745_v2 }
0x1041   :  { %2263 = vmatprep.subr.mxu0 %v2489_v0 }
0x1042   :  { %2264 = vmatpush3.msra.mxu0 %v1744_v5 }
0x1043   :  { %2265 = vmatprep.subr.mxu0 %v2489_v0 }
0x1044   :  { %2266 = vmatpush3.msra.mxu0 %v1743_v8 }
0x1045   :  { %2267 = vmatprep.subr.mxu0 %v2489_v0 }
0x1046   :  { %2268 = vmatpush3.msra.mxu0 %v1742_v9 }
0x105b   :  { %v1518_v10 = vpop.permute.xlu1 %1517 }
0x105c   :  { %1521 = vst.msk [vmem:[#allocation8 + $0x10] sm:$0xff] %vm221_vm2, %v1518_v10  ;;  %2259 = vmatmul.mubr.msk.f32.vlgmr.msra.gmra.mxu1 %vm221_vm2, %v1518_v10 }
0x105d   :  { %2280 = vmatprep.mubr.msk.f32.mxu1 %vm2490_vm0, %v2489_v0  ;;  %2273 = vmatpush3.msra.mxu1 %v1823_v12 }
0x105e   :  { %2274 = vmatprep.subr.mxu1 %v2489_v0 }
0x105f   :  { %2275 = vmatpush3.msra.mxu1 %v1822_v39 }
0x1060   :  { %2276 = vmatprep.subr.mxu1 %v2489_v0 }
0x1061   :  { %2277 = vmatpush3.msra.mxu1 %v1821_v14 }
0x1062   :  { %2278 = vmatprep.subr.mxu1 %v2489_v0 }
0x1063   :  { %2279 = vmatpush3.msra.mxu1 %v1820_v41 }
0x10ff   :  { %v1596_v13 = vpop.f32.mrf.mxu0 }
0x1100   :  { %v1600_v16 = vadd.f32 %v1596_v13, %v2686_v59 }
0x1101   :  { %v2249_v17 = vpop.f32.mrf.mxu0 }
0x1102   :  { %2388 = vtanh.f32 %v1600_v16  ;;  %v2021_v48 = vmul.f32 -1.442695, %v1600_v16 }
0x110f   :  { %v2389_v50 = vpop.eup %2388 }
0x1110   :  { %1689 = vrot.lane.b32.xlu0 %v2389_v50, %s2491_s0 }
0x111c   :  { %v1675_v18 = vpop.f32.mrf.mxu1 }
0x111d   :  { %v1679_v19 = vadd.f32 %v1675_v18, %v2667_v38 }
0x111e   :  { %v2260_v20 = vpop.f32.mrf.mxu1 }
0x111f   :  { %2390 = vtanh.f32 %v1679_v19  ;;  %v2022_v24 = vmul.f32 -1.442695, %v1679_v19 }
0x1120   :  { %2392 = vpow2.f32 %v2021_v48 }
0x112c   :  { %v2391_v21 = vpop.eup %2390 }
0x112d   :  { %1713 = vrot.lane.b32.xlu1 %v2391_v21, %s2491_s0  ;;  %v2393_v22 = vpop.eup %2392 }
0x112e   :  { %v1683_v23 = vadd.f32 1.0, %v2393_v22 }
0x1130   :  { %2394 = vrcp.f32 %v1683_v23 }
0x1131   :  { %2396 = vpow2.f32 %v2022_v24 }
0x113d   :  { %v2395_v59 = vpop.eup %2394 }
0x113e   :  { %v2397_v27 = vpop.eup %2396  ;;  %v1687_v45 = vmul.f32 %v2395_v59, %v1479_v56 }
0x113f   :  { %v1707_v28 = vadd.f32 1.0, %v2397_v27 }
0x1141   :  { %2398 = vrcp.f32 %v1707_v28 }
0x114e   :  { %v2399_v38 = vpop.eup %2398 }
0x114f   :  { %v1711_v36 = vmul.f32 %v2399_v38, %v1503_v1 }
0x1182   :  { %v1690_v25 = vpop.permute.xlu0 %1689 }
0x1183   :  { %v1692_v26 = vmul.f32 %v2395_v59, %v1690_v25 }
0x1185   :  { %1694 = vrot.lane.b32.xlu0 %v1692_v26, %s2492_s4 }
0x119f   :  { %v1714_v29 = vpop.permute.xlu1 %1713 }
0x11a0   :  { %v1716_v30 = vmul.f32 %v2399_v38, %v1714_v29 }
0x11a2   :  { %1718 = vrot.lane.b32.xlu1 %v1716_v30, %s2492_s4 }
0x11f7   :  { %v1695_v32 = vpop.permute.xlu0 %1694 }
0x11f8   :  { %v2923_v33 = vadd.f32 %v1695_v32, %v1687_v45 }
0x11fa   :  { %2400 = vtanh.f32 %v2923_v33 }
0x1207   :  { %v2401_v34 = vpop.eup %2400 }
0x1208   :  { %1700 = vrot.lane.b32.xlu0 %v2401_v34, %s2491_s0 }
0x1214   :  { %v1719_v53 = vpop.permute.xlu1 %1718 }
0x1215   :  { %v2927_v37 = vadd.f32 %v1719_v53, %v1711_v36 }
0x1217   :  { %2402 = vtanh.f32 %v2927_v37 }
0x1224   :  { %v2403_v11 = vpop.eup %2402 }
0x1225   :  { %1724 = vrot.lane.b32.xlu1 %v2403_v11, %s2491_s0 }
0x127a   :  { %v1701_v15 = vpop.permute.xlu0 %1700 }
0x127b   :  { %v1703_v43 = vmul.f32 %v2395_v59, %v1701_v15 }
0x127d   :  { %1729 = vrot.lane.b32.xlu0 %v1703_v43, %s2492_s4 }
0x1297   :  { %v1725_v44 = vpop.permute.xlu1 %1724 }
0x1298   :  { %v1727_v55 = vmul.f32 %v2399_v38, %v1725_v44 }
0x129a   :  { %1735 = vrot.lane.b32.xlu1 %v1727_v55, %s2492_s4 }
0x12ef   :  { %v1730_v46 = vpop.permute.xlu0 %1729 }
0x12f0   :  { %1733 = vst.msk [vmem:[#allocation7 + $0x30] sm:$0xff] %vm221_vm2, %v1730_v46  ;;  %2270 = vmatmul.mubr.msk.f32.vlgmr.msra.gmra.mxu0 %vm221_vm2, %v1730_v46 }
0x130c   :  { %v1736_v47 = vpop.permute.xlu1 %1735 }
0x130d   :  { %1739 = vst.msk [vmem:[#allocation8 + $0x8] sm:$0xff] %vm221_vm2, %v1736_v47  ;;  %2281 = vmatmul.mubr.msk.f32.vlgmr.msra.gmra.mxu1 %vm221_vm2, %v1736_v47 }
0x13b0   :  { %v1814_v0 = vpop.f32.mrf.mxu0 }
0x13b1   :  { %v1818_v40 = vadd.f32 %v1814_v0, %v2690_v63 }
0x13b2   :  { %v2271_v49 = vpop.f32.mrf.mxu0 }
0x13b3   :  { %2404 = vtanh.f32 %v1818_v40  ;;  %v2025_v56 = vmul.f32 -1.442695, %v1818_v40 }
0x13c0   :  { %v2405_v42 = vpop.eup %2404 }
0x13c1   :  { %1906 = vrot.lane.b32.xlu0 %v2405_v42, %s2491_s0 }
0x13cd   :  { %v1892_v51 = vpop.f32.mrf.mxu1 }
0x13ce   :  { %v1896_v52 = vadd.f32 %v1892_v51, %v2663_v31 }
0x13cf   :  { %v2282_v54 = vpop.f32.mrf.mxu1 }
0x13d0   :  { %2406 = vtanh.f32 %v1896_v52  ;;  %v2026_v62 = vmul.f32 -1.442695, %v1896_v52 }
0x13d1   :  { %2408 = vpow2.f32 %v2025_v56 }
0x13dd   :  { %v2407_v57 = vpop.eup %2406 }
0x13de   :  { %1930 = vrot.lane.b32.xlu1 %v2407_v57, %s2491_s0  ;;  %v2409_v58 = vpop.eup %2408 }
0x13df   :  { %v1900_v60 = vadd.f32 1.0, %v2409_v58 }
0x13e1   :  { %2410 = vrcp.f32 %v1900_v60 }
0x13e2   :  { %2412 = vpow2.f32 %v2026_v62 }
0x13ee   :  { %v2411_v63 = vpop.eup %2410 }
0x13ef   :  { %v2413_v3 = vpop.eup %2412  ;;  %v1904_v61 = vmul.f32 %v2411_v63, %v2923_v33 }
0x13f0   :  { %v1924_v4 = vadd.f32 1.0, %v2413_v3 }
0x13f2   :  { %2414 = vrcp.f32 %v1924_v4 }
0x13ff   :  { %v2415_v31 = vpop.eup %2414 }
0x1400   :  { %v1928_v17 = vmul.f32 %v2415_v31, %v2927_v37 }
0x1433   :  { %v1907_v1 = vpop.permute.xlu0 %1906 }
0x1434   :  { %v1909_v35 = vmul.f32 %v2411_v63, %v1907_v1 }
0x1436   :  { %1911 = vrot.lane.b32.xlu0 %v1909_v35, %s2492_s4 }
0x1450   :  { %v1931_v6 = vpop.permute.xlu1 %1930 }
0x1451   :  { %v1933_v7 = vmul.f32 %v2415_v31, %v1931_v6 }
0x1453   :  { %1935 = vrot.lane.b32.xlu1 %v1933_v7, %s2492_s4 }
0x14a8   :  { %v1912_v10 = vpop.permute.xlu0 %1911 }
0x14a9   :  { %v1914_v13 = vadd.f32 %v1912_v10, %v1904_v61 }
0x14ab   :  { %2416 = vtanh.f32 %v1914_v13 }
0x14b8   :  { %v2417_v16 = vpop.eup %2416 }
0x14b9   :  { %1917 = vrot.lane.b32.xlu0 %v2417_v16, %s2491_s0 }
0x14c5   :  { %v1936_v50 = vpop.permute.xlu1 %1935 }
0x14c6   :  { %v1938_v18 = vadd.f32 %v1936_v50, %v1928_v17 }
0x14c8   :  { %2418 = vtanh.f32 %v1938_v18 }
0x14d5   :  { %v2419_v19 = vpop.eup %2418 }
0x14d6   :  { %1941 = vrot.lane.b32.xlu1 %v2419_v19, %s2491_s0 }
0x152b   :  { %v1918_v20 = vpop.permute.xlu0 %1917 }
0x152c   :  { %v1920_v21 = vmul.f32 %v2411_v63, %v1918_v20 }
0x152e   :  { %1946 = vrot.lane.b32.xlu0 %v1920_v21, %s2492_s4 }
0x1548   :  { %v1942_v48 = vpop.permute.xlu1 %1941 }
0x1549   :  { %v1944_v22 = vmul.f32 %v2415_v31, %v1942_v48 }
0x154b   :  { %1952 = vrot.lane.b32.xlu1 %v1944_v22, %s2492_s4 }
0x15a0   :  { %v1947_v23 = vpop.permute.xlu0 %1946 }
0x15a1   :  { %1950 = vst.msk [vmem:[#allocation7 + $0x38] sm:$0xff] %vm221_vm2, %v1947_v23 }
0x15a2   :  { %2451 = shalt.err (!%p2448_p9)
}
0x15a3   :  { %1967 = dma.vmem_to_hbm [thread:$0]  %s1962_s20, 1024, %s2986_s5, [#allocation6], %s2487_s24, %s2487_s24, %s2488_s25  }
0x15a4   :  { %s2494_s26 = smov [#allocation8]  }
0x15a5   :  { %s1973_s27 = sshll.u32 %s2494_s26, 4  ;;  %s1974_s27 = int_to_ptr.vmem [resolvable:$true] %s1973_s27 }
0x15a6   :  { %s2460_s28 = scalar_lea.vmem %s1974_s27, 1024  ;;  %p2465_p11 = scmp.lt.s32.totalorder %s1974_s27, %s1974_s27 }
0x15a7   :  { %p2461_p10 = scmp.ne.s32.totalorder %s1974_s27, %s2460_s28  ;;  %p2466_p12 = scmp.lt.s32.totalorder %s2460_s28, %s2460_s28 }
0x15a9   :  { %p2467_p13 = por %p2466_p12, %p2465_p11 }
0x15ab   :  { %p2468_p0 = pnand %p2467_p13, %p2461_p10 }
0x15bd   :  { %v1953_v24 = vpop.permute.xlu1 %1952 }
0x15be   :  { %1955 = vst.msk [vmem:[#allocation8] sm:$0xff] %vm221_vm2, %v1953_v24 }
0x15bf   :  { %2471 = shalt.err (!%p2468_p0)
}
0x15c0   :  { %1979 = dma.vmem_to_hbm [thread:$0]  %s1974_s27, 1024, %s2987_s6, [#allocation9], %s2487_s24, %s2487_s24, %s2488_s25  }
0x15c1   :  { %2482 = dma.done.wait [#allocation6], 1024  }
0x15c2   :  { %2483 = vsyncadd [#allocation6], 4294966272 }
0x15c3   :  { %2484 = dma.done.wait [#allocation9], 1024  }
0x15c4   :  { %2485 = vsyncadd [#allocation9], 4294966272 }
0x15c5   :  { %1986 = vsyncpa [#allocation5], 1 }
0x15c6   :  { %1987 = vsyncpa [#allocation6], 1 }
0x15c7   :  { %1988 = vsyncpa [#allocation9], 1 }

</bundles_post_ra>
